<compile_context>
chip_gen: v7x
topology: tpu7x:2x2x1
jax: 0.10.0
libtpu: 0.0.40
codegen_flags: <defaults>
</compile_context>

<pallas_src>
import functools
import math

import jax
import jax.numpy as jnp
from jax.experimental import pallas as pl
from jax.experimental.pallas import tpu as pltpu


# ----------------------------------------------------------------------------- #
# Kernels
# ----------------------------------------------------------------------------- #
def _fused_gcn_kernel(x_ref, w_ref, adj_ref, out_ref, *, eps):
    """One batch element per grid step: support, aggregate and LayerNorm fused.

    x_ref:   (Np, Fin)  f32
    w_ref:   (Fin, Fout) bf16   (pre-cast once in the wrapper)
    adj_ref: (Np, Np)   f32     (cast to bf16 here, right before the MXU)
    out_ref: (Np, Fout) f32
    """
    support = jnp.dot(x_ref[...].astype(jnp.bfloat16), w_ref[...],
                      preferred_element_type=jnp.float32).astype(jnp.bfloat16)
    agg = jnp.dot(adj_ref[...].astype(jnp.bfloat16), support,
                  preferred_element_type=jnp.float32)
    mean = jnp.mean(agg, axis=-1, keepdims=True)
    cen = agg - mean
    var = jnp.mean(cen * cen, axis=-1, keepdims=True)
    out_ref[...] = (cen * jax.lax.rsqrt(var + eps)).astype(out_ref.dtype)


def _support_kernel(x_ref, w_ref, h_ref):
    """support = x @ W with batch folded into rows.

    x_ref: (tm, Fin) f32 | w_ref: (Fin, Fout) bf16 | h_ref: (tm, Fout) bf16
    """
    h = jnp.dot(x_ref[...].astype(jnp.bfloat16), w_ref[...],
                preferred_element_type=jnp.float32)
    h_ref[...] = h.astype(h_ref.dtype)


def _aggregate_ln_kernel(adj_ref, h_ref, out_ref, *, tk, eps):
    """out = LayerNorm(adj @ support), tiled; reduction axis (k) is the last grid axis.

    adj_ref: (tq, tk)     f32  (cast to bf16 in-kernel -> adj read once as f32)
    h_ref:   (n_pad, Fout) bf16 full per-batch support slab, resident across (i, k)
    out_ref: (tq, Fout)   f32  resident across k (same block index) -> used as the
                               accumulator directly (no scratch).
    """
    k = pl.program_id(2)

    @pl.when(k == 0)
    def _init():
        out_ref[...] = jnp.zeros_like(out_ref)

    start = pl.multiple_of(k * tk, tk)
    h_blk = h_ref[pl.ds(start, tk), :]                       # slice resident slab
    out_ref[...] += jnp.dot(adj_ref[...].astype(jnp.bfloat16), h_blk,
                            preferred_element_type=jnp.float32)

    @pl.when(k == pl.num_programs(2) - 1)
    def _finalize():
        acc = out_ref[...]
        mean = jnp.mean(acc, axis=-1, keepdims=True)
        cen = acc - mean
        var = jnp.mean(cen * cen, axis=-1, keepdims=True)
        out_ref[...] = (cen * jax.lax.rsqrt(var + eps)).astype(out_ref.dtype)   # EUP rsqrt


# ----------------------------------------------------------------------------- #
# Wrappers
# ----------------------------------------------------------------------------- #
def _round_up(v, m):
    return (v + m - 1) // m * m


def _pick_tile(extent, candidates=(512, 256, 128)):
    for t in candidates:
        if extent % t == 0:
            return t
    return extent


def _maybe_pad(x, adj, n_pad):
    n = x.shape[1]
    if n_pad == n:
        return x, adj
    return (jnp.pad(x, ((0, 0), (0, n_pad - n), (0, 0))),
            jnp.pad(adj, ((0, 0), (0, n_pad - n), (0, n_pad - n))))


def _fused_forward(x, w_bf16, adj, eps):
    B, N, Fin = x.shape
    Fout = w_bf16.shape[1]
    n_pad = _round_up(N, 128)
    x, adj = _maybe_pad(x, adj, n_pad)   # small by construction -> pad cost is noise

    out = pl.pallas_call(
        functools.partial(_fused_gcn_kernel, eps=eps),
        out_shape=jax.ShapeDtypeStruct((B, n_pad, Fout), jnp.float32),
        grid_spec=pltpu.PrefetchScalarGridSpec(
            num_scalar_prefetch=0,
            grid=(B,),
            in_specs=[
                pl.BlockSpec((pl.Squeezed(), n_pad, Fin), lambda b: (b, 0, 0)),
                pl.BlockSpec((Fin, Fout), lambda b: (0, 0)),
                pl.BlockSpec((pl.Squeezed(), n_pad, n_pad), lambda b: (b, 0, 0)),
            ],
            out_specs=pl.BlockSpec((pl.Squeezed(), n_pad, Fout), lambda b: (b, 0, 0)),
        ),
        compiler_params=pltpu.CompilerParams(dimension_semantics=("parallel",)),
    )(x, w_bf16, adj)

    return out[:, :N, :] if n_pad != N else out


def _tiled_forward(x, w_bf16, adj, eps):
    B, N, Fin = x.shape
    Fout = w_bf16.shape[1]

    # Pad node dim to a multiple of 128 only if needed (supply N as a multiple of
    # 128 for large graphs to skip this copy entirely).
    n_pad = _round_up(N, 128)
    x, adj = _maybe_pad(x, adj, n_pad)

    # ---- Stage 1: support = x @ W  (batch folded into rows, bf16 MXU, f32 acc) --
    rows = B * n_pad
    tm = _pick_tile(rows)
    x2d = x.reshape(rows, Fin)
    support = pl.pallas_call(
        _support_kernel,
        out_shape=jax.ShapeDtypeStruct((rows, Fout), jnp.bfloat16),
        grid_spec=pltpu.PrefetchScalarGridSpec(
            num_scalar_prefetch=0,
            grid=(rows // tm,),
            in_specs=[
                pl.BlockSpec((tm, Fin), lambda i: (i, 0)),
                pl.BlockSpec((Fin, Fout), lambda i: (0, 0)),
            ],
            out_specs=pl.BlockSpec((tm, Fout), lambda i: (i, 0)),
        ),
        compiler_params=pltpu.CompilerParams(dimension_semantics=("parallel",)),
    )(x2d, w_bf16).reshape(B, n_pad, Fout)

    # ---- Stage 2: out = LayerNorm(adj @ support) --------------------------------
    tq = tk = _pick_tile(n_pad)
    # VMEM: f32 adj tiles (2 bufs) + resident bf16 support slab (2 bufs) + f32 out.
    vmem_est = 2 * tq * tk * 4 + 2 * n_pad * Fout * 2 + 2 * tq * Fout * 4
    vmem_limit = int(min(48 << 20, max(32 << 20, 2 * vmem_est)))   # v7x-safe cap

    out = pl.pallas_call(
        functools.partial(_aggregate_ln_kernel, tk=tk, eps=eps),
        out_shape=jax.ShapeDtypeStruct((B, n_pad, Fout), jnp.float32),
        grid_spec=pltpu.PrefetchScalarGridSpec(
            num_scalar_prefetch=0,
            grid=(B, n_pad // tq, n_pad // tk),          # reduction axis last
            in_specs=[
                pl.BlockSpec((pl.Squeezed(), tq, tk), lambda b, i, k: (b, i, k)),
                # Full per-batch support slab: block index constant across (i, k)
                # -> DMA'd once per batch instead of once per (i, k).
                pl.BlockSpec((pl.Squeezed(), n_pad, Fout), lambda b, i, k: (b, 0, 0)),
            ],
            out_specs=pl.BlockSpec((pl.Squeezed(), tq, Fout), lambda b, i, k: (b, i, 0)),
        ),
        compiler_params=pltpu.CompilerParams(
            dimension_semantics=("parallel", "parallel", "arbitrary"),
            vmem_limit_bytes=vmem_limit),
    )(adj, support)

    return out[:, :N, :] if n_pad != N else out


def graph_convolution_forward(x, w, adj, *, eps=1e-5, mode="auto"):
    """GCN layer forward.

    x   : [B, N, Fin]  f32
    w   : [Fin, Fout]  f32   (torch Linear weight, transposed)
    adj : [B, N, N]    f32
    returns [B, N, Fout] f32
    """
    _, N, _ = x.shape
    w_bf16 = w.astype(jnp.bfloat16)           # tiny; avoids a per-step cast in-kernel
    if mode == "auto":
        # Fuse when the per-batch f32 adj block (double-buffered) + activations fit
        # comfortably inside the default scoped VMEM on all generations.
        mode = "fused" if N <= 512 else "tiled"
    if mode == "fused":
        return _fused_forward(x, w_bf16, adj, eps)
    return _tiled_forward(x, w_bf16, adj, eps)


# ----------------------------------------------------------------------------- #
# Demo / self-check
# ----------------------------------------------------------------------------- #
if __name__ == "__main__":
    def make_inputs(B, N, Fin, Fout):
        kx, kw, ka = jax.random.split(jax.random.PRNGKey(0), 3)
        x = jax.random.normal(kx, (B, N, Fin), dtype=jnp.float32)
        # nn.Linear(in, out, bias=False) default init, stored transposed [Fin, Fout].
        bound = 1.0 / math.sqrt(Fin)
        w = jax.random.uniform(kw, (Fin, Fout), minval=-bound, maxval=bound,
                               dtype=jnp.float32)
        # Row-normalized adjacency with self loops.
        a = (jax.random.uniform(ka, (B, N, N)) > 0.5).astype(jnp.float32)
        a = jnp.maximum(a, jnp.eye(N, dtype=jnp.float32)[None])
        adj = a / jnp.sum(a, axis=-1, keepdims=True)
        return x, w, adj

    def reference(x, w, adj, eps=1e-5):
        agg = jnp.einsum("bnm,bmo->bno", adj, jnp.einsum("bnf,fo->bno", x, w))
        mean = jnp.mean(agg, axis=-1, keepdims=True)
        var = jnp.mean((agg - mean) ** 2, axis=-1, keepdims=True)
        return (agg - mean) / jnp.sqrt(var + eps)

    cases = [
        ("fused", 2, 200, 128, 128, "auto"),    # small graph -> single fused kernel
        ("tiled", 2, 300, 128, 128, "tiled"),   # force tiled path (pads 300->384, multi-k)
    ]
    for name, B, N, FIN, FOUT, mode in cases:
        x, w, adj = make_inputs(B, N, FIN, FOUT)
        out = jax.block_until_ready(graph_convolution_forward(x, w, adj, mode=mode))
        ref = reference(x, w, adj)
        assert out.shape == (B, N, FOUT)
        max_err = float(jnp.max(jnp.abs(out - ref)))
        # bf16 MXU inputs with f32 accumulation -> small bounded deviation post-LN.
        assert jnp.allclose(out, ref, atol=5e-2, rtol=5e-2), (
            f"{name}: mismatch vs reference, max abs diff = {max_err}")

    print("KERNEL_OK")
</pallas_src>

<mosaic_0001>
module attributes {stable_mosaic.version = 11 : i64} {
  func.func @_fused_gcn_kernel(%arg0: i32, %arg1: memref<1x256x128xf32, #tpu.memory_space<vmem>>, %arg2: memref<128x128xbf16, #tpu.memory_space<vmem>>, %arg3: memref<1x256x256xf32, #tpu.memory_space<vmem>>, %arg4: memref<1x256x128xf32, #tpu.memory_space<vmem>>) attributes {dimension_semantics = [#tpu.dimension_semantics<parallel>], iteration_bounds = array<i64: 2>, scalar_prefetch = 0 : i64, scratch_operands = 0 : i64, tpu.core_type = #tpu.core_type<tc>, window_params = [{transform_indices = @transform_0, window_bounds = array<i64: 1, 256, 128>}, {pipeline_mode = #tpu.pipeline_mode<synchronous>, transform_indices = @transform_1, window_bounds = array<i64: 128, 128>}, {transform_indices = @transform_2, window_bounds = array<i64: 1, 256, 256>}, {transform_indices = @transform_3, window_bounds = array<i64: 1, 256, 128>}]} {
    %c0 = arith.constant 0 : index
    %c0_0 = arith.constant 0 : index
    %c0_1 = arith.constant 0 : index
    %0 = vector.load %arg1[%c0, %c0_0, %c0_1] : memref<1x256x128xf32, #tpu.memory_space<vmem>>, vector<1x256x128xf32>
    %1 = vector.shape_cast %0 : vector<1x256x128xf32> to vector<256x128xf32>
    %2 = arith.truncf %1 : vector<256x128xf32> to vector<256x128xbf16>
    %c0_2 = arith.constant 0 : index
    %c0_3 = arith.constant 0 : index
    %3 = vector.load %arg2[%c0_2, %c0_3] : memref<128x128xbf16, #tpu.memory_space<vmem>>, vector<128x128xbf16>
    %cst = arith.constant dense<0.000000e+00> : vector<256x128xf32>
    %4 = tpu.matmul %2, %3, %cst {dimension_numbers = #tpu.dot_dimension_numbers<[1], [0], [0], [1], [0, 0, 1, 1], [], []>} : vector<256x128xbf16>, vector<128x128xbf16>, vector<256x128xf32> -> vector<256x128xf32>
    %5 = arith.truncf %4 : vector<256x128xf32> to vector<256x128xbf16>
    %c0_4 = arith.constant 0 : index
    %c0_5 = arith.constant 0 : index
    %c0_6 = arith.constant 0 : index
    %6 = vector.load %arg3[%c0_4, %c0_5, %c0_6] : memref<1x256x256xf32, #tpu.memory_space<vmem>>, vector<1x256x256xf32>
    %7 = vector.shape_cast %6 : vector<1x256x256xf32> to vector<256x256xf32>
    %8 = arith.truncf %7 : vector<256x256xf32> to vector<256x256xbf16>
    %cst_7 = arith.constant dense<0.000000e+00> : vector<256x128xf32>
    %9 = tpu.matmul %8, %5, %cst_7 {dimension_numbers = #tpu.dot_dimension_numbers<[1], [0], [0], [1], [0, 0, 1, 1], [], []>} : vector<256x256xbf16>, vector<256x128xbf16>, vector<256x128xf32> -> vector<256x128xf32>
    %cst_8 = arith.constant dense<0.000000e+00> : vector<256xf32>
    %10 = vector.multi_reduction <add>, %9, %cst_8 [1] : vector<256x128xf32> to vector<256xf32>
    %11 = vector.shape_cast %10 : vector<256xf32> to vector<256x1xf32>
    %cst_9 = arith.constant 1.280000e+02 : f32
    %12 = vector.broadcast %cst_9 : f32 to vector<256x1xf32>
    %13 = arith.divf %11, %12 : vector<256x1xf32>
    %14 = vector.broadcast %13 : vector<256x1xf32> to vector<256x128xf32>
    %15 = arith.subf %9, %14 : vector<256x128xf32>
    %16 = arith.mulf %15, %15 : vector<256x128xf32>
    %cst_10 = arith.constant dense<0.000000e+00> : vector<256xf32>
    %17 = vector.multi_reduction <add>, %16, %cst_10 [1] : vector<256x128xf32> to vector<256xf32>
    %18 = vector.shape_cast %17 : vector<256xf32> to vector<256x1xf32>
    %cst_11 = arith.constant 1.280000e+02 : f32
    %19 = vector.broadcast %cst_11 : f32 to vector<256x1xf32>
    %20 = arith.divf %18, %19 : vector<256x1xf32>
    %cst_12 = arith.constant 9.99999974E-6 : f32
    %21 = vector.broadcast %cst_12 : f32 to vector<256x1xf32>
    %22 = arith.addf %20, %21 : vector<256x1xf32>
    %23 = math.rsqrt %22 : vector<256x1xf32>
    %24 = vector.broadcast %23 : vector<256x1xf32> to vector<256x128xf32>
    %25 = arith.mulf %15, %24 : vector<256x128xf32>
    %c0_13 = arith.constant 0 : index
    %c0_14 = arith.constant 0 : index
    %c0_15 = arith.constant 0 : index
    %26 = vector.load %arg4[%c0_13, %c0_14, %c0_15] : memref<1x256x128xf32, #tpu.memory_space<vmem>>, vector<1x256x128xf32>
    %27 = vector.shape_cast %26 : vector<1x256x128xf32> to vector<256x128xf32>
    %28 = vector.shape_cast %25 : vector<256x128xf32> to vector<1x256x128xf32>
    tpu.vector_store %arg4[%c0_13, %c0_14, %c0_15], %28 {strides = array<i32>} : memref<1x256x128xf32, #tpu.memory_space<vmem>>, vector<1x256x128xf32>,
    return
  }
  func.func @transform_0(%arg0: i32) -> (i32, i32, i32) {
    %c0_i32 = arith.constant 0 : i32
    %c0_i32_0 = arith.constant 0 : i32
    %c0_i32_1 = arith.constant 0 : i32
    return %arg0, %c0_i32, %c0_i32_0 : i32, i32, i32
  }
  func.func @transform_1(%arg0: i32) -> (i32, i32) {
    %c0_i32 = arith.constant 0 : i32
    %c0_i32_0 = arith.constant 0 : i32
    %c0_i32_1 = arith.constant 0 : i32
    return %c0_i32, %c0_i32_0 : i32, i32
  }
  func.func @transform_2(%arg0: i32) -> (i32, i32, i32) {
    %c0_i32 = arith.constant 0 : i32
    %c0_i32_0 = arith.constant 0 : i32
    %c0_i32_1 = arith.constant 0 : i32
    return %arg0, %c0_i32, %c0_i32_0 : i32, i32, i32
  }
  func.func @transform_3(%arg0: i32) -> (i32, i32, i32) {
    %c0_i32 = arith.constant 0 : i32
    %c0_i32_0 = arith.constant 0 : i32
    %c0_i32_1 = arith.constant 0 : i32
    return %arg0, %c0_i32, %c0_i32_0 : i32, i32, i32
  }
}

</mosaic_0001>

<bundles_post_ra>
// kernel: tpu_custom_call.1
= control target key start
LH: loop header
LB: loop body
LE: loop exit
PB: predicated region body
PF: predicated region fallthrough
CT: control target
= control target key end

     0   :  { %8 = vsyncpa [#allocation3], 0  ;;  %s2530_s0 = inlined_call_operand.hbm [shape: f32[2,256,128], index: 0, kind: input, shape index: {}]   ;;  %s2531_s1 = inlined_call_operand.hbm [shape: bf16[128,128], index: 1, kind: input, shape index: {}]   ;;  %s2532_s2 = inlined_call_operand.hbm [shape: f32[2,256,256], index: 2, kind: input, shape index: {}]   ;;  %s2533_s3 = inlined_call_operand.hbm [shape: f32[2,256,128], index: 3, kind: output, shape index: {}]  }
   0x1   :  { %10 = vsyncpa [#allocation3 + $0x1], 0 }
   0x2   :  { %11 = vsyncpa [#allocation6], 0 }
   0x3   :  { %12 = vsyncpa [#allocation4], 0 }
   0x4   :  { %14 = vsyncpa [#allocation4 + $0x1], 0  ;;  %s1859_s12 = smov 0   ;;  %s1861_s13 = smov 0  }
   0x5   :  { %s1863_s14 = smov 0   ;;  %s1865_s15 = smov 0  }
   0x6 LB: > { %s1880_s16 = sadd.s32 1, %s1825_s15   ;;  %s27_s17 = sadd.s32 1, %s1821_s14  ;;  %s1825_s15 = sphi %s1865_s15, %s2560_s15   ;;  %s1821_s14 = sphi %s1863_s14, %s2559_s14   ;;  %s1817_s13 = sphi %s1861_s13, %s2558_s13   ;;  %s1813_s12 = sphi %s1859_s12, %s2557_s12  }
   0x7   : > { %s24_s18 = ssub.s32 %s1825_s15, %s1880_s16  ;;  %p34_p0 = scmp.ne.s32.totalorder %s1821_s14, %s1817_s13 }
   0x8   : > { %p25_p1 = scmp.eq.s32.totalorder %s24_s18, 0  ;;  %p35_p2 = scmp.eq.s32.totalorder %s1825_s15, 0 }
   0x9   : > { %p1547_p4 = scmp.lt.s32.totalorder %s1825_s15, 2  ;;  %s150_s20 = sand.u32 1, %s1825_s15  }
   0xa   : > { %s1891_s19 = scalar_select %p25_p1, %s1821_s14, %s27_s17  }
   0xb   : > { %p36_p5 = por %p35_p2, %p34_p0  ;;  %s152_s21 = sand.u32 1, %s1821_s14  }
   0xc   : > { %s1294_s22 = sshll.u32 %s152_s21, 8  ;;  %s1318_s23 = sshll.u32 %s1825_s15, 12 }
   0xd   : > { %s1904_s26 = scalar_lea.hbm %s2530_s0, %s1318_s23  ;;  %s154_s27 = scalar_lea.vmem [#allocation2], %s1294_s22 }
   0xe   : > { %s161_s28 = sshll.u32 %s154_s27, 4  ;;  %p1906_p6 = pnand %p1547_p4, %p36_p5  ;;  %s1910_s28 = int_to_ptr.vmem [resolvable:$true] %s161_s28 }
   0xf   : > { %s1912_s30 = scalar_lea.sflag [#allocation3], %s150_s20  ;;  %s1663_s4 = scalar_lea.hbm %s1904_s26, 4096 }
  0x10   : > { %s2541_s29 = scalar_select %p1906_p6, 1, 0 }
  0x11   : > { %p1664_p7 = scmp.ne.s32.totalorder %s1904_s26, %s1663_s4  ;;  %p2535_p8 = pneg %p1906_p6 }
  0x12   : > { %s1668_s7 = scalar_lea.hbm %s2530_s0, 8192  ;;  %p1669_p11 = scmp.lt.u32.totalorder %s1904_s26, %s2530_s0 }
  0x13   : > { %p1666_p9 = pnand %p2535_p8, %p1664_p7  ;;  %p1670_p12 = scmp.lt.u32.totalorder %s1668_s7, %s1663_s4 }
  0x14   : > { %p1672_p1 = scmp.lt.u32.totalorder %s1663_s4, %s1904_s26 }
  0x15   : > { %p1667_p10 = pneg %p1666_p9  ;;  %p1671_p13 = por %p1670_p12, %p1669_p11 }
  0x17   : > { %p1673_p2 = por %p1672_p1, %p1671_p13 }
  0x19   : > { %p1674_p4 = pnand %p1673_p2, %p1667_p10 }
  0x1b   : > { %1677 = shalt.err (!%p1674_p4)
}
  0x1c   : > { %s1678_s10 = scalar_lea.vmem %s1910_s28, 4096  ;;  %s1827_s11 = smov [#allocation2]  }
  0x1d   : > { %p1679_p5 = scmp.ne.s32.totalorder %s1910_s28, %s1678_s10  ;;  %s1683_s17 = sshll.u32 %s1827_s11, 4  ;;  %s1684_s17 = int_to_ptr.vmem [resolvable:$false] %s1683_s17 }
  0x1e   : > { %s1685_s18 = scalar_lea.vmem %s1684_s17, 8192  ;;  %p1686_p3 = scmp.lt.s32.totalorder %s1910_s28, %s1684_s17 }
  0x1f   : > { %p1681_p7 = pnand %p1679_p5, %p2535_p8  ;;  %p1687_p11 = scmp.lt.s32.totalorder %s1685_s18, %s1678_s10 }
  0x21   : > { %p1682_p9 = pneg %p1681_p7  ;;  %p1688_p12 = por %p1687_p11, %p1686_p3 }
  0x23   : > { %p1689_p13 = pnand %p1688_p12, %p1682_p9 }
  0x25   : > { %1692 = shalt.err (!%p1689_p13)
}
  0x26   : > { %s1828_s20 = smov 128   ;;  %s1829_s22 = smov 8  }
  0x27   : > { %1538 = dma.hbm_to_vmem [thread:$0]  (!%p1906_p6), %s1904_s26, 4096, %s1910_s28, %s1912_s30, %s1828_s20, %s1828_s20, %s1829_s22  }
  0x28   : > { %s1297_s23 = sshll.u32 %s152_s21, 9  ;;  %s1943_s27 = sadd.s32 4294967295, %s1825_s15  }
  0x29   : > { %s175_s24 = scalar_lea.vmem [#allocation7], %s1297_s23  ;;  %s1290_s4 = sadd.s32 4294967294, %s1825_s15  }
  0x2a   : > { %s182_s25 = sshll.u32 %s175_s24, 4  ;;  %p40_p3 = scmp.ne.s32.totalorder %s1817_s13, %s1813_s12  ;;  %s1976_s25 = int_to_ptr.vmem [resolvable:$true] %s182_s25 }
  0x2b   : > { %p2534_p10 = scmp.eq.s32.totalorder %s1943_s27, 0  ;;  %p111_p1 = scmp.eq.s32.totalorder %s1943_s27, 1 }
  0x2c   : > { %p117_p2 = scmp.eq.s32.totalorder %s1290_s4, 1  ;;  %p1291_p4 = scmp.ge.s32.totalorder %s1825_s15, 1 }
  0x2d   : > { %p1953_p5 = por %p2534_p10, %p40_p3  ;;  %p1960_p7 = por %p111_p1, %p34_p0 }
  0x2e   : > { %p1964_p9 = por %p117_p2, %p40_p3  ;;  %p124_p11 = scmp.lt.s32.totalorder %s1825_s15, 3 }
  0x2f   : > { %s2542_s26 = scalar_select %p1953_p5, 1, 0 }
  0x30   : > { %s2543_s21 = scalar_select %p1960_p7, 1, 0 }
  0x31   : > { %s2544_s28 = scalar_select %p1964_p9, 1, 0 }
  0x32   : > { %p1969_p12 = pnand %p1291_p4, %p124_p11  ;;  %s1830_s6 = smov [#allocation5]  }
  0x33   : > { %s136_s7 = sshll.u32 %s1830_s6, 4  ;;  %s1319_s8 = sshll.u32 %s1825_s15, 13  ;;  %s137_s7 = int_to_ptr.vmem [resolvable:$true] %s136_s7 }
  0x34   : > { %s2545_s5 = scalar_select %p1969_p12, 1, 0 }
  0x35   : > { %p1531_p13 = pneg %p1969_p12  ;;  %s1987_s17 = scalar_lea.hbm %s2532_s2, %s1319_s8 }
  0x36   : > { %s1693_s22 = scalar_lea.hbm %s2531_s1, 1024 }
  0x37   : > { %p1980_p0 = pnand %p1531_p13, %p2534_p10  ;;  %p1694_p3 = scmp.ne.s32.totalorder %s2531_s1, %s1693_s22 }
  0x38   : > { %p1700_p11 = scmp.lt.u32.totalorder %s1693_s22, %s2531_s1 }
  0x39   : > { %p1695_p1 = pneg %p1980_p0 }
  0x3b   : > { %p1696_p2 = pnand %p1695_p1, %p1694_p3 }
  0x3d   : > { %p1697_p4 = pneg %p1696_p2 }
  0x3f   : > { %p1702_p13 = pnand %p1700_p11, %p1697_p4 }
  0x41   : > { %1705 = shalt.err (!%p1702_p13)
}
  0x42   : > { %s1706_s8 = scalar_lea.vmem %s137_s7, 1024  ;;  %p1714_p7 = scmp.lt.s32.totalorder %s137_s7, %s137_s7 }
  0x43   : > { %p1707_p10 = scmp.ne.s32.totalorder %s137_s7, %s1706_s8  ;;  %p1715_p5 = scmp.lt.s32.totalorder %s1706_s8, %s1706_s8 }
  0x45   : > { %p1709_p8 = pnand %p1707_p10, %p1695_p1  ;;  %p1716_p12 = por %p1715_p5, %p1714_p7 }
  0x47   : > { %p1710_p9 = pneg %p1709_p8 }
  0x49   : > { %p1717_p6 = pnand %p1716_p12, %p1710_p9 }
  0x4b   : > { %1720 = shalt.err (!%p1717_p6)
}
  0x4c   : > { %s1831_s10 = smov 64   ;;  %s1832_s11 = smov 4  }
  0x4d   : > { %1534 = dma.hbm_to_vmem [thread:$0]  (!%p1980_p0), %s2531_s1, 1024, %s137_s7, [#allocation6], %s1831_s10, %s1831_s10, %s1832_s11  }
  0x4e   : > { %s1721_s22 = scalar_lea.hbm %s1987_s17, 8192  ;;  %p2547_p10 = scmp.ne.s32.totalorder %s2541_s29, 0 }
  0x4f   : > { %p1722_p8 = scmp.ne.s32.totalorder %s1987_s17, %s1721_s22  ;;  %s1726_s4 = scalar_lea.hbm %s2532_s2, 16384 }
  0x50   : > { %p2548_p3 = pneg %p2547_p10  ;;  %p1727_p6 = scmp.lt.u32.totalorder %s1987_s17, %s2532_s2 }
  0x51   : > { %p1728_p9 = scmp.lt.u32.totalorder %s1726_s4, %s1721_s22  ;;  %p1730_p1 = scmp.lt.u32.totalorder %s1721_s22, %s1987_s17 }
  0x52   : > { %p1724_p5 = pnand %p1722_p8, %p2548_p3 }
  0x53   : > { %p1729_p12 = por %p1728_p9, %p1727_p6 }
  0x54   : > { %p1725_p7 = pneg %p1724_p5 }
  0x55   : > { %p1731_p2 = por %p1730_p1, %p1729_p12 }
  0x57   : > { %p1732_p4 = pnand %p1731_p2, %p1725_p7 }
  0x59   : > { %1735 = shalt.err (!%p1732_p4)
}
  0x5a   : > { %s1736_s7 = scalar_lea.vmem %s1976_s25, 8192  ;;  %p2549_p11 = pmov %p2548_p3 }
  0x5b   : > { %p1737_p0 = scmp.ne.s32.totalorder %s1976_s25, %s1736_s7  ;;  %s1833_s9 = smov [#allocation7]  }
  0x5c   : > { %s1741_s10 = sshll.u32 %s1833_s9, 4  ;;  %s1742_s10 = int_to_ptr.vmem [resolvable:$false] %s1741_s10 }
  0x5d   : > { %p1739_p13 = pnand %p1737_p0, %p2549_p11  ;;  %s1743_s11 = scalar_lea.vmem %s1742_s10, 16384 }
  0x5e   : > { %p1744_p3 = scmp.lt.s32.totalorder %s1976_s25, %s1742_s10  ;;  %p1745_p5 = scmp.lt.s32.totalorder %s1743_s11, %s1736_s7 }
  0x5f   : > { %p1740_p8 = pneg %p1739_p13 }
  0x60   : > { %p1746_p6 = por %p1745_p5, %p1744_p3 }
  0x62   : > { %p1747_p9 = pnand %p1746_p6, %p1740_p8 }
  0x64   : > { %1750 = shalt.err (!%p1747_p9)
}
  0x65   : > { %s1834_s18 = smov 256   ;;  %s1835_s20 = smov 16  }
  0x66   : > { %1541 = dma.hbm_to_vmem [thread:$0]  (!%p2547_p10), %s1987_s17, 8192, %s1976_s25, %s1912_s30, %s1834_s18, %s1834_s18, %s1835_s20  }
  0x67   : > { %p2550_p7 = scmp.ne.s32.totalorder %s2545_s5, 0 }
  0x68   : > { %s196_s22 = sand.u32 (!%p2550_p7), 1, %s1943_s27   ;;  %s2033_s23 = sand.u32 (!%p2550_p7), 1, %s1817_s13  }
  0x69   : > { %194 = sbr.rel (%p2550_p7) target bundleno = 1060 (0x424), region = 32  ;;  %s1301_s24 = sshll.u32 (!%p2550_p7), %s2033_s23, 8 }
  0x6a   : > { %s197_s4 = scalar_lea.sflag (!%p2550_p7), [#allocation3], %s196_s22  ;;  %s2038_s6 = scalar_lea.vmem (!%p2550_p7), [#allocation2], %s1301_s24 }
  0x6b   : > { %p2551_p12 = scmp.ne.s32.totalorder (!%p2550_p7), %s2542_s26, 0 }
  0x70   : > { %1796 = dma.done.wait (%p2551_p12), %s197_s4, 4096  }
  0x71   : > { %1798 = vsyncadd (%p2551_p12), %s197_s4, 4294963200  ;;  %p2552_p10 = scmp.eq.s32.totalorder %s1943_s27, 0 }
  0x73   : > { %1800 = dma.done.wait (%p2552_p10), [#allocation6], 1024   ;;  %p2553_p1 = pmov %p2552_p10 }
  0x74   : > { %s1303_s29 = sshll.u32 %s2033_s23, 9 }
  0x75   : > { %1802 = vsyncadd (%p2553_p1), [#allocation6], 4294966272  ;;  %s2049_s30 = scalar_lea.vmem [#allocation7], %s1303_s29 }
  0x76   : > { %1804 = dma.done.wait (%p2551_p12), %s197_s4, 8192  }
  0x77   : > { %1806 = vsyncadd (%p2551_p12), %s197_s4, 4294959104  ;;  %v1591_v0 = vld [vmem:[#allocation5] sm:$0xff]   ;;  %v1592_v1 = vld [vmem:[#allocation5 + $0x8] sm:$0xff]   ;;  %s2414_s25 = scalar_lea.vmem [#allocation8], %s1301_s24  ;;  %s1320_s26 = sshll.u32 %s1943_s27, 12 }
  0x78   : > { %1457 = vmatprep.subr.bf16.mxu0 %v1591_v0  ;;  %v1593_v2 = vld [vmem:[#allocation5 + $0x10] sm:$0xff]   ;;  %v1594_v3 = vld [vmem:[#allocation5 + $0x18] sm:$0xff]   ;;  %v242_v4 = vld [vmem:[%s2038_s6] sm:$0xff]  ;;  %s1187_s5 = sshll.u32 %s2414_s25, 4  ;;  %s2481_s7 = scalar_lea.hbm %s2533_s3, %s1320_s26  ;;  %s2483_s5 = int_to_ptr.vmem [resolvable:$true] %s1187_s5 }
  0x79   : > { %1458 = vmatpush3.bf16.msra.mxu0 %v1591_v0  ;;  %v243_v5 = vld [vmem:[%s2038_s6 + $0x8] sm:$0xff]  ;;  %v1595_v7 = vld [vmem:[#allocation5 + $0x20] sm:$0xff]   ;;  %v1597_v9 = vld [vmem:[#allocation5 + $0x30] sm:$0xff]   ;;  %s1174_s27 = scalar_lea.sflag [#allocation4], %s2033_s23  ;;  %s1751_s9 = scalar_lea.vmem %s2483_s5, 4096 }
  0x7a   : > { %1459 = vmatprep.subr.bf16.mxu0 %v1592_v1  ;;  %v274_v6 = vpack.c.bf16 %v243_v5, %v242_v4  ;;  %v1596_v8 = vld [vmem:[#allocation5 + $0x28] sm:$0xff]   ;;  %v1598_v10 = vld [vmem:[#allocation5 + $0x38] sm:$0xff]   ;;  %v244_v11 = vld [vmem:[%s2038_s6 + $0x10] sm:$0xff]  ;;  %p1752_p2 = scmp.ne.s32.totalorder %s2483_s5, %s1751_s9  ;;  %p2554_p4 = scmp.ne.s32.totalorder %s2543_s21, 0 }
  0x7b   : > { %v245_v12 = vld [vmem:[%s2038_s6 + $0x18] sm:$0xff]  ;;  %v246_v13 = vld [vmem:[%s2038_s6 + $0x20] sm:$0xff]  ;;  %v247_v14 = vld [vmem:[%s2038_s6 + $0x28] sm:$0xff]  ;;  %s1836_s10 = smov [#allocation8]  }
  0x7c   : > { %1473 = vmatprep.mubr.bf16.mxu0 %v274_v6  ;;  %v275_v15 = vpack.c.bf16 %v245_v12, %v244_v11  ;;  %v276_v16 = vpack.c.bf16 %v247_v14, %v246_v13  ;;  %v248_v17 = vld [vmem:[%s2038_s6 + $0x30] sm:$0xff]  ;;  %v249_v18 = vld [vmem:[%s2038_s6 + $0x38] sm:$0xff]  ;;  %v250_v19 = vld [vmem:[%s2038_s6 + $0x40] sm:$0xff]  ;;  %p1753_p0 = pnand %p1752_p2, %p2554_p4  ;;  %s1755_s11 = sshll.u32 %s1836_s10, 4  ;;  %s1756_s11 = int_to_ptr.vmem [resolvable:$false] %s1755_s11 }
  0x7d   : > { %1460 = vmatpush3.bf16.msra.mxu0 %v1592_v1  ;;  %v251_v20 = vld [vmem:[%s2038_s6 + $0x48] sm:$0xff]  ;;  %v277_v21 = vpack.c.bf16 %v249_v18, %v248_v17  ;;  %v252_v23 = vld [vmem:[%s2038_s6 + $0x50] sm:$0xff]  ;;  %v253_v24 = vld [vmem:[%s2038_s6 + $0x58] sm:$0xff]  ;;  %s1757_s18 = scalar_lea.vmem %s1756_s11, 8192  ;;  %p1758_p13 = scmp.lt.s32.totalorder %s2483_s5, %s1756_s11 }
  0x7e   : > { %1461 = vmatprep.subr.bf16.mxu0 %v1593_v2  ;;  %v278_v22 = vpack.c.bf16 %v251_v20, %v250_v19  ;;  %v254_v25 = vld [vmem:[%s2038_s6 + $0x60] sm:$0xff]  ;;  %v255_v26 = vld [vmem:[%s2038_s6 + $0x68] sm:$0xff]  ;;  %v279_v27 = vpack.c.bf16 %v253_v24, %v252_v23  ;;  %v256_v29 = vld [vmem:[%s2038_s6 + $0x70] sm:$0xff]  ;;  %p1754_p11 = pneg %p1753_p0  ;;  %p1759_p8 = scmp.lt.s32.totalorder %s1757_s18, %s1751_s9 }
  0x7f   : > { %v280_v28 = vpack.c.bf16 %v255_v26, %v254_v25  ;;  %v257_v30 = vld [vmem:[%s2038_s6 + $0x78] sm:$0xff]  ;;  %v258_v31 = vld [vmem:[%s2038_s6 + $0x80] sm:$0xff]  ;;  %v259_v32 = vld [vmem:[%s2038_s6 + $0x88] sm:$0xff] }
  0x80   : > { %v281_v33 = vpack.c.bf16 %v257_v30, %v256_v29  ;;  %v282_v34 = vpack.c.bf16 %v259_v32, %v258_v31  ;;  %v260_v35 = vld [vmem:[%s2038_s6 + $0x90] sm:$0xff]  ;;  %v261_v36 = vld [vmem:[%s2038_s6 + $0x98] sm:$0xff]  ;;  %v262_v37 = vld [vmem:[%s2038_s6 + $0xa0] sm:$0xff]  ;;  %p1760_p3 = por %p1759_p8, %p1758_p13 }
  0x81   : > { %1462 = vmatpush3.bf16.msra.mxu0 %v1593_v2  ;;  %v263_v38 = vld [vmem:[%s2038_s6 + $0xa8] sm:$0xff]  ;;  %v283_v39 = vpack.c.bf16 %v261_v36, %v260_v35  ;;  %v264_v41 = vld [vmem:[%s2038_s6 + $0xb0] sm:$0xff]  ;;  %v265_v42 = vld [vmem:[%s2038_s6 + $0xb8] sm:$0xff] }
  0x82   : > { %1463 = vmatprep.subr.bf16.mxu0 %v1594_v3  ;;  %v284_v40 = vpack.c.bf16 %v263_v38, %v262_v37  ;;  %v266_v43 = vld [vmem:[%s2038_s6 + $0xc0] sm:$0xff]  ;;  %v267_v44 = vld [vmem:[%s2038_s6 + $0xc8] sm:$0xff]  ;;  %v285_v45 = vpack.c.bf16 %v265_v42, %v264_v41  ;;  %v268_v47 = vld [vmem:[%s2038_s6 + $0xd0] sm:$0xff]  ;;  %p1761_p5 = pnand %p1760_p3, %p1754_p11 }
  0x83   : > { %v286_v46 = vpack.c.bf16 %v267_v44, %v266_v43  ;;  %v269_v48 = vld [vmem:[%s2038_s6 + $0xd8] sm:$0xff]  ;;  %v270_v49 = vld [vmem:[%s2038_s6 + $0xe0] sm:$0xff]  ;;  %v271_v50 = vld [vmem:[%s2038_s6 + $0xe8] sm:$0xff] }
  0x84   : > { %v287_v51 = vpack.c.bf16 %v269_v48, %v268_v47  ;;  %v288_v52 = vpack.c.bf16 %v271_v50, %v270_v49  ;;  %v272_v53 = vld [vmem:[%s2038_s6 + $0xf0] sm:$0xff]  ;;  %v273_v54 = vld [vmem:[%s2038_s6 + $0xf8] sm:$0xff]  ;;  %v532_v56 = vld [vmem:[%s2049_s30 + $0x8] sm:$0xff] }
  0x85   : > { %1464 = vmatpush3.bf16.msra.mxu0 %v1594_v3  ;;  %v289_v55 = vpack.c.bf16 %v273_v54, %v272_v53  ;;  %v534_v57 = vld [vmem:[%s2049_s30 + $0x18] sm:$0xff]  ;;  %v548_v58 = vld [vmem:[%s2049_s30 + $0x88] sm:$0xff]  ;;  %v533_v47 = vld [vmem:[%s2049_s30 + $0x10] sm:$0xff] }
  0x86   : > { %1465 = vmatprep.subr.bf16.mxu0 %v1595_v7  ;;  %v596_v59 = vpack.c.bf16 %v534_v57, %v532_v56  ;;  %v550_v60 = vld [vmem:[%s2049_s30 + $0x98] sm:$0xff]  ;;  %v547_v48 = vld [vmem:[%s2049_s30 + $0x80] sm:$0xff]  ;;  %v549_v49 = vld [vmem:[%s2049_s30 + $0x90] sm:$0xff] }
  0x87   : > { %v604_v61 = vpack.c.bf16 %v550_v60, %v548_v58  ;;  %v536_v50 = vld [vmem:[%s2049_s30 + $0x28] sm:$0xff]  ;;  %v554_v53 = vld [vmem:[%s2049_s30 + $0xb8] sm:$0xff]  ;;  %v535_v58 = vld [vmem:[%s2049_s30 + $0x20] sm:$0xff] }
  0x88   : > { %v551_v60 = vld [vmem:[%s2049_s30 + $0xa0] sm:$0xff] }
  0x89   : > { %1466 = vmatpush3.bf16.msra.mxu0 %v1595_v7  ;;  %691 = vmatprep.mubr.bf16.mxu1 %v604_v61  ;;  %v553_v61 = vld [vmem:[%s2049_s30 + $0xb0] sm:$0xff] }
  0x8a   : > { %1467 = vmatprep.subr.bf16.mxu0 %v1596_v8 }
  0x8d   : > { %1468 = vmatpush3.bf16.msra.mxu0 %v1596_v8 }
  0x8e   : > { %1469 = vmatprep.subr.bf16.mxu0 %v1597_v9 }
  0x91   : > { %1470 = vmatpush3.bf16.msra.mxu0 %v1597_v9 }
  0x92   : > { %1471 = vmatprep.subr.bf16.mxu0 %v1598_v10 }
  0x95   : > { %1472 = vmatpush3.bf16.msra.mxu0 %v1598_v10 }
  0x98   : > { %1474 = vmatmul.mubr.bf16.vlgmr.msra.gmra.mrb[0].mxu0 %v275_v15 }
  0x99   : > { %1477 = vmatprep.mubr.bf16.mxu0 %v276_v16 }
  0xa0   : > { %1478 = vmatmul.mubr.bf16.gmra.mrb[4].mxu0 %v277_v21 }
  0xa1   : > { %1481 = vmatprep.mubr.bf16.mxu0 %v278_v22 }
  0xa8   : > { %1482 = vmatmul.mubr.bf16.gmra.mrb[8].mxu0 %v279_v27 }
  0xa9   : > { %1485 = vmatprep.mubr.bf16.mxu0 %v280_v28 }
  0xb0   : > { %1486 = vmatmul.mubr.bf16.gmra.mrb[12].mxu0 %v281_v33 }
  0xb1   : > { %1489 = vmatprep.mubr.bf16.mxu0 %v282_v34 }
  0xb8   : > { %1490 = vmatmul.mubr.bf16.gmra.mrb[16].mxu0 %v283_v39 }
  0xb9   : > { %1493 = vmatprep.mubr.bf16.mxu0 %v284_v40 }
  0xc0   : > { %1494 = vmatmul.mubr.bf16.gmra.mrb[20].mxu0 %v285_v45 }
  0xc1   : > { %1497 = vmatprep.mubr.bf16.mxu0 %v286_v46  ;;  %v531_v46 = vld [vmem:[%s2049_s30] sm:$0xff] }
  0xc2   : > { %v595_v54 = vpack.c.bf16 %v533_v47, %v531_v46  ;;  %v577_v46 = vld [vmem:[%s2049_s30 + $0x170] sm:$0xff]  ;;  %v580_v47 = vld [vmem:[%s2049_s30 + $0x188] sm:$0xff] }
  0xc8   : > { %1498 = vmatmul.mubr.bf16.gmra.mrb[24].mxu0 %v287_v51  ;;  %v538_v51 = vld [vmem:[%s2049_s30 + $0x38] sm:$0xff] }
  0xc9   : > { %1501 = vmatprep.mubr.bf16.mxu0 %v288_v52  ;;  %v552_v52 = vld [vmem:[%s2049_s30 + $0xa8] sm:$0xff]  ;;  %v598_v56 = vpack.c.bf16 %v538_v51, %v536_v50  ;;  %v579_v51 = vld [vmem:[%s2049_s30 + $0x180] sm:$0xff] }
  0xca   : > { %v606_v57 = vpack.c.bf16 %v554_v53, %v552_v52  ;;  %v581_v52 = vld [vmem:[%s2049_s30 + $0x190] sm:$0xff]  ;;  %v584_v53 = vld [vmem:[%s2049_s30 + $0x1a8] sm:$0xff] }
  0xd0   : > { %1502 = vmatmul.mubr.bf16.gmra.mrb[28].mxu0 %v289_v55  ;;  %v603_v55 = vpack.c.bf16 %v549_v49, %v547_v48  ;;  %v582_v48 = vld [vmem:[%s2049_s30 + $0x198] sm:$0xff] }
  0xd1   : > { %659 = vmatprep.mubr.bf16.mxu0 %v596_v59  ;;  %v537_v59 = vld [vmem:[%s2049_s30 + $0x30] sm:$0xff]  ;;  %v620_v50 = vpack.c.bf16 %v582_v48, %v580_v47 }
 0x16b   : > { %v1475_v62 = vpop.f32.mrb[0].mxu0 }
 0x16c   : > { %v388_v63 = vpop.f32.mrb[1].mxu0 }
 0x16d   : > { %v1476_v0 = vpop.f32.mrb[2].mxu0 }
 0x16e   : > { %v516_v1 = vpack.c.bf16 %v1476_v0, %v1475_v62  ;;  %v391_v2 = vpop.f32.mrb[3].mxu0  ;;  %v540_v62 = vld [vmem:[%s2049_s30 + $0x48] sm:$0xff] }
 0x16f   : > { %v515_v3 = vpack.c.bf16 %v391_v2, %v388_v63  ;;  %v542_v63 = vld [vmem:[%s2049_s30 + $0x58] sm:$0xff]  ;;  %v556_v0 = vld [vmem:[%s2049_s30 + $0xc8] sm:$0xff]  ;;  %v597_v2 = vpack.c.bf16 %v537_v59, %v535_v58  ;;  %v585_v58 = vld [vmem:[%s2049_s30 + $0x1b0] sm:$0xff] }
 0x170   : > { %v588_v59 = vld [vmem:[%s2049_s30 + $0x1c8] sm:$0xff] }
 0x173   : > { %v1479_v4 = vpop.f32.mrb[4].mxu0 }
 0x174   : > { %v404_v5 = vpop.f32.mrb[5].mxu0 }
 0x175   : > { %v1480_v6 = vpop.f32.mrb[6].mxu0 }
 0x176   : > { %v518_v7 = vpack.c.bf16 %v1480_v6, %v1479_v4  ;;  %v407_v8 = vpop.f32.mrb[7].mxu0  ;;  %v600_v4 = vpack.c.bf16 %v542_v63, %v540_v62  ;;  %v539_v6 = vld [vmem:[%s2049_s30 + $0x40] sm:$0xff] }
 0x177   : > { %v517_v9 = vpack.c.bf16 %v407_v8, %v404_v5  ;;  %v555_v8 = vld [vmem:[%s2049_s30 + $0xc0] sm:$0xff] }
 0x178   : > { %v587_v63 = vld [vmem:[%s2049_s30 + $0x1c0] sm:$0xff] }
 0x17b   : > { %v1483_v10 = vpop.f32.mrb[8].mxu0 }
 0x17c   : > { %v420_v11 = vpop.f32.mrb[9].mxu0 }
 0x17d   : > { %v1484_v12 = vpop.f32.mrb[10].mxu0 }
 0x17e   : > { %v520_v13 = vpack.c.bf16 %v1484_v12, %v1483_v10  ;;  %v423_v14 = vpop.f32.mrb[11].mxu0  ;;  %v544_v10 = vld [vmem:[%s2049_s30 + $0x68] sm:$0xff] }
 0x17f   : > { %v519_v15 = vpack.c.bf16 %v423_v14, %v420_v11  ;;  %v546_v11 = vld [vmem:[%s2049_s30 + $0x78] sm:$0xff]  ;;  %v560_v12 = vld [vmem:[%s2049_s30 + $0xe8] sm:$0xff] }
 0x183   : > { %v1487_v16 = vpop.f32.mrb[12].mxu0 }
 0x184   : > { %v436_v17 = vpop.f32.mrb[13].mxu0 }
 0x185   : > { %v1488_v18 = vpop.f32.mrb[14].mxu0 }
 0x186   : > { %v2091_v19 = vpack.c.bf16 %v1488_v18, %v1487_v16  ;;  %v439_v20 = vpop.f32.mrb[15].mxu0  ;;  %v602_v16 = vpack.c.bf16 %v546_v11, %v544_v10  ;;  %v543_v18 = vld [vmem:[%s2049_s30 + $0x60] sm:$0xff] }
 0x187   : > { %v521_v21 = vpack.c.bf16 %v439_v20, %v436_v17  ;;  %v559_v20 = vld [vmem:[%s2049_s30 + $0xe0] sm:$0xff] }
 0x18b   : > { %v1491_v22 = vpop.f32.mrb[16].mxu0 }
 0x18c   : > { %v452_v23 = vpop.f32.mrb[17].mxu0 }
 0x18d   : > { %v1492_v24 = vpop.f32.mrb[18].mxu0 }
 0x18e   : > { %v524_v25 = vpack.c.bf16 %v1492_v24, %v1491_v22  ;;  %v455_v26 = vpop.f32.mrb[19].mxu0  ;;  %v564_v22 = vld [vmem:[%s2049_s30 + $0x108] sm:$0xff] }
 0x18f   : > { %v523_v27 = vpack.c.bf16 %v455_v26, %v452_v23  ;;  %v566_v23 = vld [vmem:[%s2049_s30 + $0x118] sm:$0xff] }
 0x190   : > { %v612_v26 = vpack.c.bf16 %v566_v23, %v564_v22 }
 0x191   : > { %1345 = vmatprep.subr.bf16.mxu0 %v523_v27  ;;  %1505 = vmatprep.subr.bf16.mxu1 %v523_v27  ;;  %v563_v27 = vld [vmem:[%s2049_s30 + $0x100] sm:$0xff] }
 0x192   : > { %1346 = vmatpush3.bf16.msra.mxu0 %v515_v3  ;;  %1513 = vmatpush3.bf16.msra.mxu1 %v515_v3  ;;  %v605_v3 = vpack.c.bf16 %v553_v61, %v551_v60  ;;  %v590_v60 = vld [vmem:[%s2049_s30 + $0x1d8] sm:$0xff] }
 0x193   : > { %v1495_v28 = vpop.f32.mrb[20].mxu0  ;;  %1347 = vmatprep.subr.bf16.mxu0 %v524_v25  ;;  %1506 = vmatprep.subr.bf16.mxu1 %v524_v25  ;;  %v624_v62 = vpack.c.bf16 %v590_v60, %v588_v59 }
 0x194   : > { %v468_v29 = vpop.f32.mrb[21].mxu0 }
 0x195   : > { %v1496_v30 = vpop.f32.mrb[22].mxu0 }
 0x196   : > { %v526_v31 = vpack.c.bf16 %v1496_v30, %v1495_v28  ;;  %v471_v32 = vpop.f32.mrb[23].mxu0  ;;  %1348 = vmatpush3.bf16.msra.mxu0 %v516_v1  ;;  %1514 = vmatpush3.bf16.msra.mxu1 %v516_v1  ;;  %v558_v1 = vld [vmem:[%s2049_s30 + $0xd8] sm:$0xff]  ;;  %v565_v28 = vld [vmem:[%s2049_s30 + $0x110] sm:$0xff] }
 0x197   : > { %v525_v33 = vpack.c.bf16 %v471_v32, %v468_v29  ;;  %v608_v5 = vpack.c.bf16 %v558_v1, %v556_v0  ;;  %v568_v29 = vld [vmem:[%s2049_s30 + $0x128] sm:$0xff]  ;;  %v570_v30 = vld [vmem:[%s2049_s30 + $0x138] sm:$0xff]  ;;  %v589_v0 = vld [vmem:[%s2049_s30 + $0x1d0] sm:$0xff] }
 0x198   : > { %v614_v32 = vpack.c.bf16 %v570_v30, %v568_v29  ;;  %v592_v1 = vld [vmem:[%s2049_s30 + $0x1e8] sm:$0xff] }
 0x199   : > { %1349 = vmatprep.subr.bf16.mxu0 %v525_v33  ;;  %1507 = vmatprep.subr.bf16.mxu1 %v525_v33  ;;  %v567_v33 = vld [vmem:[%s2049_s30 + $0x120] sm:$0xff] }
 0x19a   : > { %1350 = vmatpush3.bf16.msra.mxu0 %v517_v9  ;;  %1515 = vmatpush3.bf16.msra.mxu1 %v517_v9  ;;  %v557_v9 = vld [vmem:[%s2049_s30 + $0xd0] sm:$0xff] }
 0x19b   : > { %v1499_v34 = vpop.f32.mrb[24].mxu0  ;;  %1351 = vmatprep.subr.bf16.mxu0 %v526_v31  ;;  %1508 = vmatprep.subr.bf16.mxu1 %v526_v31  ;;  %v611_v31 = vpack.c.bf16 %v565_v28, %v563_v27 }
 0x19c   : > { %v484_v35 = vpop.f32.mrb[25].mxu0 }
 0x19d   : > { %v1500_v36 = vpop.f32.mrb[26].mxu0 }
 0x19e   : > { %v528_v37 = vpack.c.bf16 %v1500_v36, %v1499_v34  ;;  %v487_v38 = vpop.f32.mrb[27].mxu0  ;;  %1352 = vmatpush3.bf16.msra.mxu0 %v518_v7  ;;  %1516 = vmatpush3.bf16.msra.mxu1 %v518_v7  ;;  %v541_v7 = vld [vmem:[%s2049_s30 + $0x50] sm:$0xff]  ;;  %v574_v36 = vld [vmem:[%s2049_s30 + $0x158] sm:$0xff] }
 0x19f   : > { %v527_v39 = vpack.c.bf16 %v487_v38, %v484_v35  ;;  %v599_v14 = vpack.c.bf16 %v541_v7, %v539_v6  ;;  %v569_v34 = vld [vmem:[%s2049_s30 + $0x130] sm:$0xff]  ;;  %v572_v35 = vld [vmem:[%s2049_s30 + $0x148] sm:$0xff] }
 0x1a0   : > { %v616_v38 = vpack.c.bf16 %v574_v36, %v572_v35  ;;  %v593_v6 = vld [vmem:[%s2049_s30 + $0x1f0] sm:$0xff] }
 0x1a1   : > { %1353 = vmatprep.subr.bf16.mxu0 %v527_v39  ;;  %1509 = vmatprep.subr.bf16.mxu1 %v527_v39  ;;  %v571_v39 = vld [vmem:[%s2049_s30 + $0x140] sm:$0xff] }
 0x1a2   : > { %1354 = vmatpush3.bf16.msra.mxu0 %v519_v15  ;;  %1517 = vmatpush3.bf16.msra.mxu1 %v519_v15  ;;  %v607_v15 = vpack.c.bf16 %v557_v9, %v555_v8 }
 0x1a3   : > { %v1503_v40 = vpop.f32.mrb[28].mxu0  ;;  %1355 = vmatprep.subr.bf16.mxu0 %v528_v37  ;;  %1510 = vmatprep.subr.bf16.mxu1 %v528_v37  ;;  %v613_v37 = vpack.c.bf16 %v569_v34, %v567_v33 }
 0x1a4   : > { %v500_v41 = vpop.f32.mrb[29].mxu0 }
 0x1a5   : > { %v1504_v42 = vpop.f32.mrb[30].mxu0 }
 0x1a6   : > { %v530_v43 = vpack.c.bf16 %v1504_v42, %v1503_v40  ;;  %v503_v44 = vpop.f32.mrb[31].mxu0  ;;  %1356 = vmatpush3.bf16.msra.mxu0 %v520_v13  ;;  %1518 = vmatpush3.bf16.msra.mxu1 %v520_v13  ;;  %v562_v13 = vld [vmem:[%s2049_s30 + $0xf8] sm:$0xff]  ;;  %v573_v40 = vld [vmem:[%s2049_s30 + $0x150] sm:$0xff] }
 0x1a7   : > { %v529_v45 = vpack.c.bf16 %v503_v44, %v500_v41  ;;  %v610_v17 = vpack.c.bf16 %v562_v13, %v560_v12  ;;  %v576_v41 = vld [vmem:[%s2049_s30 + $0x168] sm:$0xff]  ;;  %v578_v42 = vld [vmem:[%s2049_s30 + $0x178] sm:$0xff] }
 0x1a8   : > { %v618_v44 = vpack.c.bf16 %v578_v42, %v576_v41 }
 0x1a9   : > { %1357 = vmatprep.subr.bf16.mxu0 %v529_v45  ;;  %1511 = vmatprep.subr.bf16.mxu1 %v529_v45  ;;  %v575_v45 = vld [vmem:[%s2049_s30 + $0x160] sm:$0xff] }
 0x1aa   : > { %1358 = vmatpush3.bf16.msra.mxu0 %v521_v21  ;;  %1519 = vmatpush3.bf16.msra.mxu1 %v521_v21  ;;  %v561_v21 = vld [vmem:[%s2049_s30 + $0xf0] sm:$0xff]  ;;  %v617_v49 = vpack.c.bf16 %v577_v46, %v575_v45 }
 0x1ab   : > { %1359 = vmatprep.subr.bf16.mxu0 %v530_v43  ;;  %1512 = vmatprep.subr.bf16.mxu1 %v530_v43  ;;  %v609_v25 = vpack.c.bf16 %v561_v21, %v559_v20  ;;  %v615_v43 = vpack.c.bf16 %v573_v40, %v571_v39 }
 0x1ae   : > { %1360 = vmatpush3.bf16.msra.mxu0 %v2091_v19  ;;  %1520 = vmatpush3.bf16.msra.mxu1 %v2091_v19  ;;  %v545_v19 = vld [vmem:[%s2049_s30 + $0x70] sm:$0xff] }
 0x1af   : > { %v601_v24 = vpack.c.bf16 %v545_v19, %v543_v18 }
 0x1b1   : > { %660 = vmatmul.mubr.bf16.vlgmr.msra.gmra.mrb[32].mxu0 %v595_v54  ;;  %692 = vmatmul.mubr.bf16.vlgmr.msra.gmra.mrb[0].mxu1 %v603_v55  ;;  %v586_v54 = vld [vmem:[%s2049_s30 + $0x1b8] sm:$0xff]  ;;  %v619_v55 = vpack.c.bf16 %v581_v52, %v579_v51 }
 0x1b2   : > { %667 = vmatprep.mubr.bf16.mxu0 %v598_v56  ;;  %699 = vmatprep.mubr.bf16.mxu1 %v606_v57  ;;  %v622_v56 = vpack.c.bf16 %v586_v54, %v584_v53  ;;  %v583_v57 = vld [vmem:[%s2049_s30 + $0x1a0] sm:$0xff] }
 0x1b3   : > { %v621_v61 = vpack.c.bf16 %v585_v58, %v583_v57 }
 0x1b9   : > { %668 = vmatmul.mubr.bf16.gmra.mrb[36].mxu0 %v597_v2  ;;  %700 = vmatmul.mubr.bf16.gmra.mrb[4].mxu1 %v605_v3  ;;  %v594_v2 = vld [vmem:[%s2049_s30 + $0x1f8] sm:$0xff]  ;;  %v623_v3 = vpack.c.bf16 %v589_v0, %v587_v63 }
 0x1ba   : > { %675 = vmatprep.mubr.bf16.mxu0 %v600_v4  ;;  %707 = vmatprep.mubr.bf16.mxu1 %v608_v5  ;;  %v626_v4 = vpack.c.bf16 %v594_v2, %v592_v1  ;;  %v591_v5 = vld [vmem:[%s2049_s30 + $0x1e0] sm:$0xff] }
 0x1bb   : > { %v625_v7 = vpack.c.bf16 %v593_v6, %v591_v5 }
 0x1c1   : > { %676 = vmatmul.mubr.bf16.gmra.mrb[40].mxu0 %v599_v14  ;;  %708 = vmatmul.mubr.bf16.gmra.mrb[8].mxu1 %v607_v15 }
 0x1c2   : > { %683 = vmatprep.mubr.bf16.mxu0 %v602_v16  ;;  %715 = vmatprep.mubr.bf16.mxu1 %v610_v17 }
 0x1c9   : > { %684 = vmatmul.mubr.bf16.gmra.mrb[44].mxu0 %v601_v24  ;;  %716 = vmatmul.mubr.bf16.gmra.mrb[12].mxu1 %v609_v25 }
 0x1ca   : > { %723 = vmatprep.mubr.bf16.mxu1 %v612_v26 }
 0x1d1   : > { %724 = vmatmul.mubr.bf16.gmra.mrb[16].mxu1 %v611_v31 }
 0x1d2   : > { %731 = vmatprep.mubr.bf16.mxu1 %v614_v32 }
 0x1d9   : > { %732 = vmatmul.mubr.bf16.gmra.mrb[20].mxu1 %v613_v37 }
 0x1da   : > { %739 = vmatprep.mubr.bf16.mxu1 %v616_v38 }
 0x1e1   : > { %740 = vmatmul.mubr.bf16.gmra.mrb[24].mxu1 %v615_v43 }
 0x1e2   : > { %747 = vmatprep.mubr.bf16.mxu1 %v618_v44 }
 0x1e9   : > { %748 = vmatmul.mubr.bf16.gmra.mrb[28].mxu1 %v617_v49 }
 0x1ea   : > { %755 = vmatprep.mubr.bf16.mxu1 %v620_v50 }
 0x1f1   : > { %756 = vmatmul.mubr.bf16.gmra.mrb[32].mxu1 %v619_v55 }
 0x1f2   : > { %763 = vmatprep.mubr.bf16.mxu1 %v622_v56 }
 0x1f9   : > { %764 = vmatmul.mubr.bf16.gmra.mrb[36].mxu1 %v621_v61 }
 0x1fa   : > { %771 = vmatprep.mubr.bf16.mxu1 %v624_v62 }
 0x201   : > { %772 = vmatmul.mubr.bf16.gmra.mrb[40].mxu1 %v623_v3 }
 0x202   : > { %779 = vmatprep.mubr.bf16.mxu1 %v626_v4 }
 0x209   : > { %780 = vmatmul.mubr.bf16.gmra.mrb[44].mxu1 %v625_v7 }
 0x284   : > { %v1361_v8 = vpop.f32.mrb[32].mxu0  ;;  %v1385_v9 = vpop.f32.mrb[0].mxu1 }
 0x285   : > { %v1362_v10 = vpop.f32.mrb[33].mxu0  ;;  %v1386_v11 = vpop.f32.mrb[1].mxu1 }
 0x286   : > { %v2155_v12 = vadd.f32 %v1362_v10, %v1361_v8  ;;  %v2157_v13 = vadd.f32 %v1386_v11, %v1385_v9  ;;  %v1388_v14 = vpop.f32.mrb[2].mxu1  ;;  %v1364_v15 = vpop.f32.mrb[34].mxu0 }
 0x287   : > { %v1389_v16 = vpop.f32.mrb[3].mxu1  ;;  %v1365_v17 = vpop.f32.mrb[35].mxu0 }
 0x288   : > { %v2159_v18 = vadd.f32 %v1389_v16, %v1388_v14  ;;  %788 = vadd.xlane.f32.xlu0 %v2155_v12  ;;  %v2162_v19 = vadd.f32 %v1365_v17, %v1364_v15 }
 0x28a   : > { %806 = vadd.xlane.f32.xlu1 %v2159_v18 }
 0x28c   : > { %v1367_v20 = vpop.f32.mrb[36].mxu0  ;;  %804 = vadd.xlane.f32.xlu0 %v2157_v13  ;;  %v1391_v21 = vpop.f32.mrb[4].mxu1 }
 0x28d   : > { %v1368_v22 = vpop.f32.mrb[37].mxu0  ;;  %v1392_v23 = vpop.f32.mrb[5].mxu1 }
 0x28e   : > { %v2166_v24 = vadd.f32 %v1368_v22, %v1367_v20  ;;  %v1370_v25 = vpop.f32.mrb[38].mxu0  ;;  %v2168_v26 = vadd.f32 %v1392_v23, %v1391_v21  ;;  %v1394_v27 = vpop.f32.mrb[6].mxu1 }
 0x28f   : > { %v1371_v28 = vpop.f32.mrb[39].mxu0  ;;  %v1395_v29 = vpop.f32.mrb[7].mxu1 }
 0x290   : > { %792 = vadd.xlane.f32.xlu1 %v2166_v24  ;;  %790 = vadd.xlane.f32.xlu0 %v2162_v19  ;;  %v2172_v30 = vadd.f32 %v1371_v28, %v1370_v25  ;;  %v2174_v31 = vadd.f32 %v1395_v29, %v1394_v27 }
 0x294   : > { %v1373_v32 = vpop.f32.mrb[40].mxu0  ;;  %794 = vadd.xlane.f32.xlu1 %v2172_v30  ;;  %808 = vadd.xlane.f32.xlu0 %v2168_v26  ;;  %v1397_v33 = vpop.f32.mrb[8].mxu1 }
 0x295   : > { %v1374_v34 = vpop.f32.mrb[41].mxu0  ;;  %v1398_v35 = vpop.f32.mrb[9].mxu1 }
 0x296   : > { %v2178_v36 = vadd.f32 %v1374_v34, %v1373_v32  ;;  %v1376_v37 = vpop.f32.mrb[42].mxu0  ;;  %v2180_v38 = vadd.f32 %v1398_v35, %v1397_v33  ;;  %v1400_v39 = vpop.f32.mrb[10].mxu1 }
 0x297   : > { %v1377_v40 = vpop.f32.mrb[43].mxu0  ;;  %v1401_v41 = vpop.f32.mrb[11].mxu1 }
 0x298   : > { %810 = vadd.xlane.f32.xlu1 %v2174_v31  ;;  %796 = vadd.xlane.f32.xlu0 %v2178_v36  ;;  %v2184_v42 = vadd.f32 %v1377_v40, %v1376_v37  ;;  %v2186_v43 = vadd.f32 %v1401_v41, %v1400_v39 }
 0x29c   : > { %v1379_v44 = vpop.f32.mrb[44].mxu0  ;;  %798 = vadd.xlane.f32.xlu1 %v2184_v42  ;;  %812 = vadd.xlane.f32.xlu0 %v2180_v38  ;;  %v1403_v45 = vpop.f32.mrb[12].mxu1 }
 0x29d   : > { %v1380_v46 = vpop.f32.mrb[45].mxu0  ;;  %v1404_v47 = vpop.f32.mrb[13].mxu1 }
 0x29e   : > { %v2190_v48 = vadd.f32 %v1380_v46, %v1379_v44  ;;  %v1382_v49 = vpop.f32.mrb[46].mxu0  ;;  %v2192_v50 = vadd.f32 %v1404_v47, %v1403_v45  ;;  %v1406_v51 = vpop.f32.mrb[14].mxu1 }
 0x29f   : > { %v1383_v52 = vpop.f32.mrb[47].mxu0  ;;  %v1407_v53 = vpop.f32.mrb[15].mxu1 }
 0x2a0   : > { %814 = vadd.xlane.f32.xlu1 %v2186_v43  ;;  %800 = vadd.xlane.f32.xlu0 %v2190_v48  ;;  %v2196_v54 = vadd.f32 %v1383_v52, %v1382_v49  ;;  %v2198_v55 = vadd.f32 %v1407_v53, %v1406_v51 }
 0x2a4   : > { %v1409_v56 = vpop.f32.mrb[16].mxu1  ;;  %802 = vadd.xlane.f32.xlu1 %v2196_v54  ;;  %816 = vadd.xlane.f32.xlu0 %v2192_v50 }
 0x2a5   : > { %v1410_v57 = vpop.f32.mrb[17].mxu1 }
 0x2a6   : > { %v2202_v58 = vadd.f32 %v1410_v57, %v1409_v56  ;;  %v1412_v59 = vpop.f32.mrb[18].mxu1 }
 0x2a7   : > { %v1413_v60 = vpop.f32.mrb[19].mxu1 }
 0x2a8   : > { %818 = vadd.xlane.f32.xlu1 %v2198_v55  ;;  %820 = vadd.xlane.f32.xlu0 %v2202_v58  ;;  %v2206_v61 = vadd.f32 %v1413_v60, %v1412_v59 }
 0x2ac   : > { %v1415_v62 = vpop.f32.mrb[20].mxu1  ;;  %822 = vadd.xlane.f32.xlu1 %v2206_v61 }
 0x2ad   : > { %v1416_v63 = vpop.f32.mrb[21].mxu1 }
 0x2ae   : > { %v2209_v0 = vadd.f32 %v1416_v63, %v1415_v62  ;;  %v1418_v1 = vpop.f32.mrb[22].mxu1 }
 0x2af   : > { %v1419_v2 = vpop.f32.mrb[23].mxu1 }
 0x2b0   : > { %v2211_v3 = vadd.f32 %v1419_v2, %v1418_v1  ;;  %824 = vadd.xlane.f32.xlu0 %v2209_v0 }
 0x2b2   : > { %826 = vadd.xlane.f32.xlu1 %v2211_v3 }
 0x2b4   : > { %v1421_v4 = vpop.f32.mrb[24].mxu1 }
 0x2b5   : > { %v1422_v5 = vpop.f32.mrb[25].mxu1 }
 0x2b6   : > { %v2215_v6 = vadd.f32 %v1422_v5, %v1421_v4  ;;  %v1424_v7 = vpop.f32.mrb[26].mxu1 }
 0x2b7   : > { %v1425_v8 = vpop.f32.mrb[27].mxu1 }
 0x2b8   : > { %v2217_v9 = vadd.f32 %v1425_v8, %v1424_v7  ;;  %828 = vadd.xlane.f32.xlu0 %v2215_v6 }
 0x2ba   : > { %830 = vadd.xlane.f32.xlu1 %v2217_v9 }
 0x2bc   : > { %v1427_v10 = vpop.f32.mrb[28].mxu1 }
 0x2bd   : > { %v1428_v11 = vpop.f32.mrb[29].mxu1 }
 0x2be   : > { %v2221_v14 = vadd.f32 %v1428_v11, %v1427_v10  ;;  %v1430_v15 = vpop.f32.mrb[30].mxu1 }
 0x2bf   : > { %v1431_v16 = vpop.f32.mrb[31].mxu1 }
 0x2c0   : > { %v2223_v17 = vadd.f32 %v1431_v16, %v1430_v15  ;;  %832 = vadd.xlane.f32.xlu0 %v2221_v14 }
 0x2c2   : > { %834 = vadd.xlane.f32.xlu1 %v2223_v17 }
 0x2c4   : > { %v1433_v20 = vpop.f32.mrb[32].mxu1 }
 0x2c5   : > { %v1434_v21 = vpop.f32.mrb[33].mxu1 }
 0x2c6   : > { %v2227_v22 = vadd.f32 %v1434_v21, %v1433_v20  ;;  %v1436_v23 = vpop.f32.mrb[34].mxu1 }
 0x2c7   : > { %v1437_v25 = vpop.f32.mrb[35].mxu1 }
 0x2c8   : > { %v2229_v27 = vadd.f32 %v1437_v25, %v1436_v23  ;;  %836 = vadd.xlane.f32.xlu0 %v2227_v22 }
 0x2ca   : > { %838 = vadd.xlane.f32.xlu1 %v2229_v27 }
 0x2cc   : > { %v1439_v28 = vpop.f32.mrb[36].mxu1 }
 0x2cd   : > { %v1440_v29 = vpop.f32.mrb[37].mxu1 }
 0x2ce   : > { %v2233_v32 = vadd.f32 %v1440_v29, %v1439_v28  ;;  %v1442_v33 = vpop.f32.mrb[38].mxu1 }
 0x2cf   : > { %v1443_v34 = vpop.f32.mrb[39].mxu1 }
 0x2d0   : > { %v2235_v35 = vadd.f32 %v1443_v34, %v1442_v33  ;;  %840 = vadd.xlane.f32.xlu0 %v2233_v32 }
 0x2d2   : > { %842 = vadd.xlane.f32.xlu1 %v2235_v35 }
 0x2d4   : > { %v1445_v37 = vpop.f32.mrb[40].mxu1 }
 0x2d5   : > { %v1446_v39 = vpop.f32.mrb[41].mxu1 }
 0x2d6   : > { %v2239_v40 = vadd.f32 %v1446_v39, %v1445_v37  ;;  %v1448_v41 = vpop.f32.mrb[42].mxu1 }
 0x2d7   : > { %v1449_v44 = vpop.f32.mrb[43].mxu1 }
 0x2d8   : > { %v2241_v45 = vadd.f32 %v1449_v44, %v1448_v41  ;;  %844 = vadd.xlane.f32.xlu0 %v2239_v40 }
 0x2da   : > { %846 = vadd.xlane.f32.xlu1 %v2241_v45 }
 0x2dc   : > { %v1451_v46 = vpop.f32.mrb[44].mxu1 }
 0x2dd   : > { %v1452_v47 = vpop.f32.mrb[45].mxu1 }
 0x2de   : > { %v2245_v49 = vadd.f32 %v1452_v47, %v1451_v46  ;;  %v1454_v51 = vpop.f32.mrb[46].mxu1 }
 0x2df   : > { %v1455_v52 = vpop.f32.mrb[47].mxu1 }
 0x2e0   : > { %v2247_v53 = vadd.f32 %v1455_v52, %v1454_v51  ;;  %848 = vadd.xlane.f32.xlu0 %v2245_v49 }
 0x2e2   : > { %850 = vadd.xlane.f32.xlu1 %v2247_v53 }
 0x315   : > { %v789_v56 = vpop.xlane.xlu0 %788 }
 0x316   : > { %v853_v57 = vmul.f32 0.0078125, %v789_v56 }
 0x317   : > { %v807_v60 = vpop.xlane.xlu1 %806 }
 0x318   : > { %v2252_v59 = vsub.f32 %v2155_v12, %v853_v57  ;;  %v862_v4 = vmul.f32 0.0078125, %v807_v60 }
 0x319   : > { %v805_v62 = vpop.xlane.xlu0 %804 }
 0x31a   : > { %v861_v63 = vmul.f32 0.0078125, %v805_v62  ;;  %v917_v1 = vmul.f32 %v2252_v59, %v2252_v59  ;;  %v2268_v16 = vsub.f32 %v2159_v18, %v862_v4 }
 0x31c   : > { %v2257_v2 = vsub.f32 %v2157_v13, %v861_v63  ;;  %949 = vadd.xlane.f32.xlu0 %v917_v1  ;;  %v926_v18 = vmul.f32 %v2268_v16, %v2268_v16 }
 0x31d   : > { %v793_v5 = vpop.xlane.xlu1 %792  ;;  %v791_v7 = vpop.xlane.xlu0 %790 }
 0x31e   : > { %v855_v8 = vmul.f32 0.0078125, %v793_v5  ;;  %v854_v10 = vmul.f32 0.0078125, %v791_v7  ;;  %v925_v11 = vmul.f32 %v2257_v2, %v2257_v2 }
 0x320   : > { %v2262_v12 = vsub.f32 %v2166_v24, %v855_v8  ;;  %v2265_v15 = vsub.f32 %v2162_v19, %v854_v10  ;;  %965 = vadd.xlane.f32.xlu0 %v925_v11 }
 0x321   : > { %v795_v13 = vpop.xlane.xlu1 %794  ;;  %v809_v20 = vpop.xlane.xlu0 %808 }
 0x322   : > { %v856_v21 = vmul.f32 0.0078125, %v795_v13  ;;  %v863_v23 = vmul.f32 0.0078125, %v809_v20  ;;  %v919_v25 = vmul.f32 %v2262_v12, %v2262_v12  ;;  %v918_v28 = vmul.f32 %v2265_v15, %v2265_v15 }
 0x324   : > { %v2275_v24 = vsub.f32 %v2168_v26, %v863_v23  ;;  %953 = vadd.xlane.f32.xlu0 %v919_v25  ;;  %951 = vadd.xlane.f32.xlu1 %v918_v28  ;;  %v2280_v33 = vsub.f32 %v2172_v30, %v856_v21 }
 0x325   : > { %v811_v19 = vpop.xlane.xlu1 %810  ;;  %v797_v29 = vpop.xlane.xlu0 %796 }
 0x326   : > { %v864_v34 = vmul.f32 0.0078125, %v811_v19  ;;  %v857_v37 = vmul.f32 0.0078125, %v797_v29  ;;  %v927_v39 = vmul.f32 %v2275_v24, %v2275_v24  ;;  %v920_v30 = vmul.f32 %v2280_v33, %v2280_v33 }
 0x328   : > { %v2285_v41 = vsub.f32 %v2178_v36, %v857_v37  ;;  %967 = vadd.xlane.f32.xlu1 %v926_v18  ;;  %969 = vadd.xlane.f32.xlu0 %v927_v39  ;;  %v2288_v26 = vsub.f32 %v2174_v31, %v864_v34 }
 0x329   : > { %v799_v44 = vpop.xlane.xlu1 %798  ;;  %v813_v46 = vpop.xlane.xlu0 %812 }
 0x32a   : > { %v858_v47 = vmul.f32 0.0078125, %v799_v44  ;;  %v865_v51 = vmul.f32 0.0078125, %v813_v46  ;;  %v921_v52 = vmul.f32 %v2285_v41, %v2285_v41  ;;  %v928_v31 = vmul.f32 %v2288_v26, %v2288_v26 }
 0x32c   : > { %v2295_v56 = vsub.f32 %v2180_v38, %v865_v51  ;;  %955 = vadd.xlane.f32.xlu1 %v920_v30  ;;  %957 = vadd.xlane.f32.xlu0 %v921_v52  ;;  %v2300_v60 = vsub.f32 %v2184_v42, %v858_v47 }
 0x32d   : > { %v815_v36 = vpop.xlane.xlu1 %814  ;;  %v801_v57 = vpop.xlane.xlu0 %800 }
 0x32e   : > { %v866_v62 = vmul.f32 0.0078125, %v815_v36  ;;  %v859_v63 = vmul.f32 0.0078125, %v801_v57  ;;  %v929_v1 = vmul.f32 %v2295_v56, %v2295_v56  ;;  %v922_v42 = vmul.f32 %v2300_v60, %v2300_v60 }
 0x330   : > { %v2305_v4 = vsub.f32 %v2190_v48, %v859_v63  ;;  %971 = vadd.xlane.f32.xlu1 %v928_v31  ;;  %973 = vadd.xlane.f32.xlu0 %v929_v1  ;;  %v2308_v38 = vsub.f32 %v2186_v43, %v866_v62 }
 0x331   : > { %v803_v5 = vpop.xlane.xlu1 %802  ;;  %v817_v7 = vpop.xlane.xlu0 %816 }
 0x332   : > { %v860_v8 = vmul.f32 0.0078125, %v803_v5  ;;  %v867_v10 = vmul.f32 0.0078125, %v817_v7  ;;  %v923_v11 = vmul.f32 %v2305_v4, %v2305_v4  ;;  %v930_v43 = vmul.f32 %v2308_v38, %v2308_v38 }
 0x334   : > { %v2315_v13 = vsub.f32 %v2192_v50, %v867_v10  ;;  %959 = vadd.xlane.f32.xlu1 %v922_v42  ;;  %961 = vadd.xlane.f32.xlu0 %v923_v11  ;;  %v2320_v21 = vsub.f32 %v2196_v54, %v860_v8 }
 0x335   : > { %v819_v48 = vpop.xlane.xlu1 %818  ;;  %v821_v20 = vpop.xlane.xlu0 %820 }
 0x336   : > { %v868_v23 = vmul.f32 0.0078125, %v819_v48  ;;  %v869_v25 = vmul.f32 0.0078125, %v821_v20  ;;  %v931_v28 = vmul.f32 %v2315_v13, %v2315_v13  ;;  %v924_v34 = vmul.f32 %v2320_v21, %v2320_v21 }
 0x338   : > { %v2325_v19 = vsub.f32 %v2202_v58, %v869_v25  ;;  %975 = vadd.xlane.f32.xlu1 %v930_v43  ;;  %977 = vadd.xlane.f32.xlu0 %v931_v28  ;;  %v2328_v29 = vsub.f32 %v2198_v55, %v868_v23 }
 0x339   : > { %v823_v50 = vpop.xlane.xlu1 %822 }
 0x33a   : > { %v870_v18 = vmul.f32 0.0078125, %v823_v50  ;;  %v933_v54 = vmul.f32 %v2325_v19, %v2325_v19  ;;  %v932_v44 = vmul.f32 %v2328_v29, %v2328_v29 }
 0x33c   : > { %963 = vadd.xlane.f32.xlu1 %v924_v34  ;;  %981 = vadd.xlane.f32.xlu0 %v933_v54  ;;  %v2335_v39 = vsub.f32 %v2206_v61, %v870_v18 }
 0x33d   : > { %v825_v37 = vpop.xlane.xlu0 %824 }
 0x33e   : > { %v871_v58 = vmul.f32 0.0078125, %v825_v37  ;;  %v934_v30 = vmul.f32 %v2335_v39, %v2335_v39 }
 0x33f   : > { %v827_v46 = vpop.xlane.xlu1 %826 }
 0x340   : > { %v2340_v55 = vsub.f32 %v2209_v0, %v871_v58  ;;  %v872_v47 = vmul.f32 0.0078125, %v827_v46  ;;  %979 = vadd.xlane.f32.xlu1 %v932_v44 }
 0x342   : > { %v2343_v51 = vsub.f32 %v2211_v3, %v872_v47  ;;  %v935_v61 = vmul.f32 %v2340_v55, %v2340_v55 }
 0x344   : > { %983 = vadd.xlane.f32.xlu1 %v934_v30  ;;  %985 = vadd.xlane.f32.xlu0 %v935_v61  ;;  %v936_v57 = vmul.f32 %v2343_v51, %v2343_v51 }
 0x345   : > { %v829_v52 = vpop.xlane.xlu0 %828 }
 0x346   : > { %v873_v36 = vmul.f32 0.0078125, %v829_v52 }
 0x347   : > { %v831_v0 = vpop.xlane.xlu1 %830 }
 0x348   : > { %v2352_v31 = vsub.f32 %v2215_v6, %v873_v36  ;;  %v874_v62 = vmul.f32 0.0078125, %v831_v0  ;;  %987 = vadd.xlane.f32.xlu1 %v936_v57 }
 0x34a   : > { %v2355_v3 = vsub.f32 %v2217_v9, %v874_v62  ;;  %v937_v63 = vmul.f32 %v2352_v31, %v2352_v31 }
 0x34c   : > { %989 = vadd.xlane.f32.xlu0 %v937_v63  ;;  %v938_v1 = vmul.f32 %v2355_v3, %v2355_v3 }
 0x34d   : > { %v833_v5 = vpop.xlane.xlu0 %832 }
 0x34e   : > { %v875_v7 = vmul.f32 0.0078125, %v833_v5  ;;  %991 = vadd.xlane.f32.xlu1 %v938_v1 }
 0x34f   : > { %v835_v8 = vpop.xlane.xlu1 %834 }
 0x350   : > { %v2362_v10 = vsub.f32 %v2221_v14, %v875_v7  ;;  %v876_v6 = vmul.f32 0.0078125, %v835_v8 }
 0x352   : > { %v2365_v42 = vsub.f32 %v2223_v17, %v876_v6  ;;  %v939_v9 = vmul.f32 %v2362_v10, %v2362_v10 }
 0x354   : > { %993 = vadd.xlane.f32.xlu0 %v939_v9  ;;  %v940_v11 = vmul.f32 %v2365_v42, %v2365_v42 }
 0x355   : > { %v837_v48 = vpop.xlane.xlu0 %836 }
 0x356   : > { %v877_v20 = vmul.f32 0.0078125, %v837_v48  ;;  %995 = vadd.xlane.f32.xlu1 %v940_v11 }
 0x357   : > { %v839_v43 = vpop.xlane.xlu1 %838 }
 0x358   : > { %v2372_v23 = vsub.f32 %v2227_v22, %v877_v20  ;;  %v878_v14 = vmul.f32 0.0078125, %v839_v43 }
 0x35a   : > { %v2375_v25 = vsub.f32 %v2229_v27, %v878_v14  ;;  %v941_v17 = vmul.f32 %v2372_v23, %v2372_v23 }
 0x35c   : > { %997 = vadd.xlane.f32.xlu0 %v941_v17  ;;  %v942_v28 = vmul.f32 %v2375_v25, %v2375_v25 }
 0x35d   : > { %v841_v50 = vpop.xlane.xlu0 %840 }
 0x35e   : > { %v879_v18 = vmul.f32 0.0078125, %v841_v50  ;;  %999 = vadd.xlane.f32.xlu1 %v942_v28 }
 0x35f   : > { %v843_v34 = vpop.xlane.xlu1 %842 }
 0x360   : > { %v2382_v54 = vsub.f32 %v2233_v32, %v879_v18  ;;  %v880_v22 = vmul.f32 0.0078125, %v843_v34 }
 0x362   : > { %v2385_v37 = vsub.f32 %v2235_v35, %v880_v22  ;;  %v943_v27 = vmul.f32 %v2382_v54, %v2382_v54 }
 0x364   : > { %1001 = vadd.xlane.f32.xlu0 %v943_v27  ;;  %v944_v58 = vmul.f32 %v2385_v37, %v2385_v37 }
 0x365   : > { %v845_v44 = vpop.xlane.xlu0 %844 }
 0x366   : > { %v881_v46 = vmul.f32 0.0078125, %v845_v44  ;;  %1003 = vadd.xlane.f32.xlu1 %v944_v58 }
 0x367   : > { %v847_v47 = vpop.xlane.xlu1 %846 }
 0x368   : > { %v2392_v30 = vsub.f32 %v2239_v40, %v881_v46  ;;  %v882_v32 = vmul.f32 0.0078125, %v847_v47 }
 0x36a   : > { %v2395_v61 = vsub.f32 %v2241_v45, %v882_v32  ;;  %v945_v35 = vmul.f32 %v2392_v30, %v2392_v30 }
 0x36c   : > { %1005 = vadd.xlane.f32.xlu0 %v945_v35  ;;  %v946_v52 = vmul.f32 %v2395_v61, %v2395_v61 }
 0x36d   : > { %v849_v36 = vpop.xlane.xlu0 %848 }
 0x36e   : > { %v883_v57 = vmul.f32 0.0078125, %v849_v36  ;;  %1007 = vadd.xlane.f32.xlu1 %v946_v52 }
 0x36f   : > { %v851_v0 = vpop.xlane.xlu1 %850 }
 0x370   : > { %v2402_v62 = vsub.f32 %v2245_v49, %v883_v57  ;;  %v884_v40 = vmul.f32 0.0078125, %v851_v0 }
 0x372   : > { %v2405_v63 = vsub.f32 %v2247_v53, %v884_v40  ;;  %v947_v45 = vmul.f32 %v2402_v62, %v2402_v62 }
 0x374   : > { %1009 = vadd.xlane.f32.xlu0 %v947_v45  ;;  %v948_v1 = vmul.f32 %v2405_v63, %v2405_v63 }
 0x376   : > { %1011 = vadd.xlane.f32.xlu1 %v948_v1 }
 0x3a9   : > { %v950_v5 = vpop.xlane.xlu0 %949 }
 0x3aa   : > { %v1013_v7 = vmul.f32 0.0078125, %v950_v5 }
 0x3ac   : > { %v1045_v8 = vadd.f32 1e-05, %v1013_v7 }
 0x3ad   : > { %v966_v6 = vpop.xlane.xlu0 %965 }
 0x3ae   : > { %1599 = vrsqrt.f32 %v1045_v8  ;;  %v1021_v9 = vmul.f32 0.0078125, %v966_v6 }
 0x3b0   : > { %v1053_v49 = vadd.f32 1e-05, %v1021_v9 }
 0x3b1   : > { %v952_v11 = vpop.xlane.xlu1 %951  ;;  %v954_v48 = vpop.xlane.xlu0 %953 }
 0x3b2   : > { %1601 = vrsqrt.f32 %v1053_v49  ;;  %v1014_v53 = vmul.f32 0.0078125, %v952_v11  ;;  %v1015_v20 = vmul.f32 0.0078125, %v954_v48 }
 0x3b4   : > { %v1046_v43 = vadd.f32 1e-05, %v1014_v53  ;;  %v1047_v14 = vadd.f32 1e-05, %v1015_v20 }
 0x3b5   : > { %v968_v17 = vpop.xlane.xlu1 %967  ;;  %v970_v28 = vpop.xlane.xlu0 %969 }
 0x3b6   : > { %1603 = vrsqrt.f32 %v1046_v43  ;;  %v1022_v50 = vmul.f32 0.0078125, %v968_v17  ;;  %v1023_v18 = vmul.f32 0.0078125, %v970_v28 }
 0x3b7   : > { %1605 = vrsqrt.f32 %v1047_v14 }
 0x3b8   : > { %v1600_v34 = vpop.eup %1599  ;;  %v1054_v22 = vadd.f32 1e-05, %v1022_v50  ;;  %v1055_v27 = vadd.f32 1e-05, %v1023_v18 }
 0x3b9   : > { %v1109_v58 = vmul.f32 %v1600_v34, %v2252_v59  ;;  %v956_v44 = vpop.xlane.xlu1 %955  ;;  %v958_v46 = vpop.xlane.xlu0 %957 }
 0x3ba   : > { %1607 = vrsqrt.f32 %v1054_v22  ;;  %v1016_v47 = vmul.f32 0.0078125, %v956_v44  ;;  %v1017_v32 = vmul.f32 0.0078125, %v958_v46 }
 0x3bb   : > { %1141 = vst [vmem:[%s2414_s25] sm:$0xff] %v1109_v58  ;;  %1609 = vrsqrt.f32 %v1055_v27 }
 0x3bc   : > { %v1602_v35 = vpop.eup %1601  ;;  %v1048_v52 = vadd.f32 1e-05, %v1016_v47  ;;  %v1049_v36 = vadd.f32 1e-05, %v1017_v32 }
 0x3bd   : > { %v1117_v57 = vmul.f32 %v1602_v35, %v2257_v2  ;;  %v972_v0 = vpop.xlane.xlu1 %971  ;;  %v974_v40 = vpop.xlane.xlu0 %973 }
 0x3be   : > { %1611 = vrsqrt.f32 %v1048_v52  ;;  %v1024_v59 = vmul.f32 0.0078125, %v972_v0  ;;  %v1025_v45 = vmul.f32 0.0078125, %v974_v40 }
 0x3bf   : > { %1149 = vst [vmem:[%s2414_s25 + $0x40] sm:$0xff] %v1117_v57  ;;  %1613 = vrsqrt.f32 %v1049_v36 }
 0x3c0   : > { %v1604_v1 = vpop.eup %1603  ;;  %v1056_v5 = vadd.f32 1e-05, %v1024_v59  ;;  %v1057_v7 = vadd.f32 1e-05, %v1025_v45 }
 0x3c1   : > { %v1606_v8 = vpop.eup %1605  ;;  %v1110_v6 = vmul.f32 %v1604_v1, %v2265_v15  ;;  %v960_v9 = vpop.xlane.xlu1 %959 }
 0x3c2   : > { %v962_v49 = vpop.xlane.xlu0 %961  ;;  %v1111_v11 = vmul.f32 %v1606_v8, %v2262_v12  ;;  %1615 = vrsqrt.f32 %v1056_v5  ;;  %v1018_v2 = vmul.f32 0.0078125, %v960_v9 }
 0x3c3   : > { %v1019_v48 = vmul.f32 0.0078125, %v962_v49  ;;  %1142 = vst [vmem:[%s2414_s25 + $0x8] sm:$0xff] %v1110_v6  ;;  %1617 = vrsqrt.f32 %v1057_v7 }
 0x3c4   : > { %v1608_v53 = vpop.eup %1607  ;;  %1143 = vst [vmem:[%s2414_s25 + $0x10] sm:$0xff] %v1111_v11  ;;  %v1050_v20 = vadd.f32 1e-05, %v1018_v2 }
 0x3c5   : > { %v1051_v43 = vadd.f32 1e-05, %v1019_v48  ;;  %v1610_v14 = vpop.eup %1609  ;;  %v1118_v17 = vmul.f32 %v1608_v53, %v2268_v16  ;;  %v976_v28 = vpop.xlane.xlu1 %975 }
 0x3c6   : > { %v978_v15 = vpop.xlane.xlu0 %977  ;;  %v1119_v50 = vmul.f32 %v1610_v14, %v2275_v24  ;;  %1619 = vrsqrt.f32 %v1050_v20  ;;  %v1026_v12 = vmul.f32 0.0078125, %v976_v28 }
 0x3c7   : > { %v1027_v18 = vmul.f32 0.0078125, %v978_v15  ;;  %1150 = vst [vmem:[%s2414_s25 + $0x48] sm:$0xff] %v1118_v17  ;;  %1621 = vrsqrt.f32 %v1051_v43 }
 0x3c8   : > { %v1612_v34 = vpop.eup %1611  ;;  %1151 = vst [vmem:[%s2414_s25 + $0x50] sm:$0xff] %v1119_v50  ;;  %v1058_v22 = vadd.f32 1e-05, %v1026_v12 }
 0x3c9   : > { %v1059_v27 = vadd.f32 1e-05, %v1027_v18  ;;  %v1614_v58 = vpop.eup %1613  ;;  %v1112_v44 = vmul.f32 %v1612_v34, %v2280_v33  ;;  %v964_v46 = vpop.xlane.xlu1 %963 }
 0x3ca   : > { %v982_v16 = vpop.xlane.xlu0 %981  ;;  %v1113_v47 = vmul.f32 %v1614_v58, %v2285_v41  ;;  %1623 = vrsqrt.f32 %v1058_v22  ;;  %v1020_v24 = vmul.f32 0.0078125, %v964_v46 }
 0x3cb   : > { %v1029_v32 = vmul.f32 0.0078125, %v982_v16  ;;  %1144 = vst [vmem:[%s2414_s25 + $0x18] sm:$0xff] %v1112_v44  ;;  %1625 = vrsqrt.f32 %v1059_v27 }
 0x3cc   : > { %v1616_v35 = vpop.eup %1615  ;;  %1145 = vst [vmem:[%s2414_s25 + $0x20] sm:$0xff] %v1113_v47  ;;  %v1052_v52 = vadd.f32 1e-05, %v1020_v24 }
 0x3cd   : > { %v1061_v36 = vadd.f32 1e-05, %v1029_v32  ;;  %v1618_v57 = vpop.eup %1617  ;;  %v1120_v0 = vmul.f32 %v1616_v35, %v2288_v26  ;;  %v980_v40 = vpop.xlane.xlu1 %979 }
 0x3ce   : > { %v1121_v33 = vmul.f32 %v1618_v57, %v2295_v56  ;;  %1627 = vrsqrt.f32 %v1052_v52  ;;  %v1028_v41 = vmul.f32 0.0078125, %v980_v40 }
 0x3cf   : > { %1152 = vst [vmem:[%s2414_s25 + $0x58] sm:$0xff] %v1120_v0  ;;  %1629 = vrsqrt.f32 %v1061_v36 }
 0x3d0   : > { %v1620_v59 = vpop.eup %1619  ;;  %1153 = vst [vmem:[%s2414_s25 + $0x60] sm:$0xff] %v1121_v33  ;;  %v1060_v45 = vadd.f32 1e-05, %v1028_v41 }
 0x3d1   : > { %v1622_v1 = vpop.eup %1621  ;;  %v1114_v5 = vmul.f32 %v1620_v59, %v2300_v60  ;;  %v984_v7 = vpop.xlane.xlu1 %983 }
 0x3d2   : > { %v986_v8 = vpop.xlane.xlu0 %985  ;;  %v1115_v26 = vmul.f32 %v1622_v1, %v2305_v4  ;;  %1631 = vrsqrt.f32 %v1060_v45  ;;  %v1030_v6 = vmul.f32 0.0078125, %v984_v7 }
 0x3d3   : > { %v1031_v56 = vmul.f32 0.0078125, %v986_v8  ;;  %1146 = vst [vmem:[%s2414_s25 + $0x28] sm:$0xff] %v1114_v5 }
 0x3d4   : > { %v1624_v9 = vpop.eup %1623  ;;  %1147 = vst [vmem:[%s2414_s25 + $0x30] sm:$0xff] %v1115_v26  ;;  %v1062_v49 = vadd.f32 1e-05, %v1030_v6 }
 0x3d5   : > { %v1063_v11 = vadd.f32 1e-05, %v1031_v56  ;;  %v1626_v2 = vpop.eup %1625  ;;  %v1122_v48 = vmul.f32 %v1624_v9, %v2308_v38  ;;  %v988_v53 = vpop.xlane.xlu1 %987 }
 0x3d6   : > { %v1123_v60 = vmul.f32 %v1626_v2, %v2315_v13  ;;  %1633 = vrsqrt.f32 %v1062_v49  ;;  %v1032_v20 = vmul.f32 0.0078125, %v988_v53 }
 0x3d7   : > { %1154 = vst [vmem:[%s2414_s25 + $0x68] sm:$0xff] %v1122_v48  ;;  %1635 = vrsqrt.f32 %v1063_v11 }
 0x3d8   : > { %v1628_v4 = vpop.eup %1627  ;;  %1155 = vst [vmem:[%s2414_s25 + $0x70] sm:$0xff] %v1123_v60  ;;  %v1064_v43 = vadd.f32 1e-05, %v1032_v20 }
 0x3d9   : > { %v1630_v14 = vpop.eup %1629  ;;  %v1116_v17 = vmul.f32 %v1628_v4, %v2320_v21  ;;  %v990_v28 = vpop.xlane.xlu0 %989 }
 0x3da   : > { %v1125_v15 = vmul.f32 %v1630_v14, %v2325_v19  ;;  %1637 = vrsqrt.f32 %v1064_v43  ;;  %v1033_v38 = vmul.f32 0.0078125, %v990_v28 }
 0x3db   : > { %1148 = vst [vmem:[%s2414_s25 + $0x38] sm:$0xff] %v1116_v17  ;;  %v992_v50 = vpop.xlane.xlu1 %991 }
 0x3dc   : > { %v1632_v13 = vpop.eup %1631  ;;  %1157 = vst [vmem:[%s2414_s25 + $0x80] sm:$0xff] %v1125_v15  ;;  %v1065_v12 = vadd.f32 1e-05, %v1033_v38  ;;  %v1034_v18 = vmul.f32 0.0078125, %v992_v50 }
 0x3dd   : > { %v1124_v34 = vmul.f32 %v1632_v13, %v2328_v29 }
 0x3de   : > { %1639 = vrsqrt.f32 %v1065_v12  ;;  %v1066_v22 = vadd.f32 1e-05, %v1034_v18 }
 0x3df   : > { %1156 = vst [vmem:[%s2414_s25 + $0x78] sm:$0xff] %v1124_v34 }
 0x3e0   : > { %v1634_v27 = vpop.eup %1633  ;;  %1641 = vrsqrt.f32 %v1066_v22 }
 0x3e1   : > { %v1636_v21 = vpop.eup %1635  ;;  %v1126_v19 = vmul.f32 %v1634_v27, %v2335_v39  ;;  %v994_v58 = vpop.xlane.xlu0 %993 }
 0x3e2   : > { %v1127_v44 = vmul.f32 %v1636_v21, %v2340_v55  ;;  %v1035_v46 = vmul.f32 0.0078125, %v994_v58 }
 0x3e3   : > { %1158 = vst [vmem:[%s2414_s25 + $0x88] sm:$0xff] %v1126_v19  ;;  %v996_v16 = vpop.xlane.xlu1 %995 }
 0x3e4   : > { %v1638_v47 = vpop.eup %1637  ;;  %1159 = vst [vmem:[%s2414_s25 + $0x90] sm:$0xff] %v1127_v44  ;;  %v1067_v24 = vadd.f32 1e-05, %v1035_v46  ;;  %v1036_v29 = vmul.f32 0.0078125, %v996_v16 }
 0x3e5   : > { %v1128_v32 = vmul.f32 %v1638_v47, %v2343_v51 }
 0x3e6   : > { %1643 = vrsqrt.f32 %v1067_v24  ;;  %v1068_v35 = vadd.f32 1e-05, %v1036_v29 }
 0x3e7   : > { %1160 = vst [vmem:[%s2414_s25 + $0x98] sm:$0xff] %v1128_v32 }
 0x3e8   : > { %v1640_v52 = vpop.eup %1639  ;;  %1645 = vrsqrt.f32 %v1068_v35 }
 0x3e9   : > { %v1129_v39 = vmul.f32 %v1640_v52, %v2352_v31  ;;  %v998_v36 = vpop.xlane.xlu0 %997 }
 0x3ea   : > { %v1642_v55 = vpop.eup %1641  ;;  %v1037_v57 = vmul.f32 0.0078125, %v998_v36 }
 0x3eb   : > { %1161 = vst [vmem:[%s2414_s25 + $0xa0] sm:$0xff] %v1129_v39  ;;  %v1130_v0 = vmul.f32 %v1642_v55, %v2355_v3  ;;  %v1000_v40 = vpop.xlane.xlu1 %999 }
 0x3ec   : > { %v1069_v33 = vadd.f32 1e-05, %v1037_v57  ;;  %v1038_v41 = vmul.f32 0.0078125, %v1000_v40 }
 0x3ed   : > { %1162 = vst [vmem:[%s2414_s25 + $0xa8] sm:$0xff] %v1130_v0 }
 0x3ee   : > { %1647 = vrsqrt.f32 %v1069_v33  ;;  %v1070_v51 = vadd.f32 1e-05, %v1038_v41 }
 0x3f0   : > { %v1644_v59 = vpop.eup %1643  ;;  %1649 = vrsqrt.f32 %v1070_v51 }
 0x3f1   : > { %v1131_v45 = vmul.f32 %v1644_v59, %v2362_v10  ;;  %v1002_v1 = vpop.xlane.xlu0 %1001 }
 0x3f2   : > { %v1646_v31 = vpop.eup %1645  ;;  %v1039_v5 = vmul.f32 0.0078125, %v1002_v1 }
 0x3f3   : > { %1163 = vst [vmem:[%s2414_s25 + $0xb0] sm:$0xff] %v1131_v45  ;;  %v1132_v7 = vmul.f32 %v1646_v31, %v2365_v42  ;;  %v1004_v8 = vpop.xlane.xlu1 %1003 }
 0x3f4   : > { %v1071_v3 = vadd.f32 1e-05, %v1039_v5  ;;  %v1040_v26 = vmul.f32 0.0078125, %v1004_v8 }
 0x3f5   : > { %1164 = vst [vmem:[%s2414_s25 + $0xb8] sm:$0xff] %v1132_v7 }
 0x3f6   : > { %1651 = vrsqrt.f32 %v1071_v3  ;;  %v1072_v6 = vadd.f32 1e-05, %v1040_v26 }
 0x3f8   : > { %v1648_v56 = vpop.eup %1647  ;;  %1653 = vrsqrt.f32 %v1072_v6 }
 0x3f9   : > { %v1133_v9 = vmul.f32 %v1648_v56, %v2372_v23  ;;  %v1006_v49 = vpop.xlane.xlu0 %1005 }
 0x3fa   : > { %v1650_v10 = vpop.eup %1649  ;;  %v1041_v11 = vmul.f32 0.0078125, %v1006_v49 }
 0x3fb   : > { %1165 = vst [vmem:[%s2414_s25 + $0xc0] sm:$0xff] %v1133_v9  ;;  %v1134_v2 = vmul.f32 %v1650_v10, %v2375_v25  ;;  %v1008_v48 = vpop.xlane.xlu1 %1007 }
 0x3fc   : > { %v1073_v42 = vadd.f32 1e-05, %v1041_v11  ;;  %v1042_v53 = vmul.f32 0.0078125, %v1008_v48 }
 0x3fd   : > { %1166 = vst [vmem:[%s2414_s25 + $0xc8] sm:$0xff] %v1134_v2 }
 0x3fe   : > { %1655 = vrsqrt.f32 %v1073_v42  ;;  %v1074_v60 = vadd.f32 1e-05, %v1042_v53 }
 0x400   : > { %v1652_v20 = vpop.eup %1651  ;;  %1657 = vrsqrt.f32 %v1074_v60 }
 0x401   : > { %v1135_v4 = vmul.f32 %v1652_v20, %v2382_v54  ;;  %v1010_v23 = vpop.xlane.xlu0 %1009 }
 0x402   : > { %v1654_v43 = vpop.eup %1653  ;;  %v1043_v14 = vmul.f32 0.0078125, %v1010_v23 }
 0x403   : > { %1167 = vst [vmem:[%s2414_s25 + $0xd0] sm:$0xff] %v1135_v4  ;;  %v1136_v25 = vmul.f32 %v1654_v43, %v2385_v37  ;;  %v1012_v17 = vpop.xlane.xlu1 %1011 }
 0x404   : > { %v1075_v28 = vadd.f32 1e-05, %v1043_v14  ;;  %v1044_v15 = vmul.f32 0.0078125, %v1012_v17 }
 0x405   : > { %1168 = vst [vmem:[%s2414_s25 + $0xd8] sm:$0xff] %v1136_v25 }
 0x406   : > { %1659 = vrsqrt.f32 %v1075_v28  ;;  %v1076_v38 = vadd.f32 1e-05, %v1044_v15 }
 0x408   : > { %v1656_v50 = vpop.eup %1655  ;;  %1661 = vrsqrt.f32 %v1076_v38 }
 0x409   : > { %v1137_v54 = vmul.f32 %v1656_v50, %v2392_v30 }
 0x40a   : > { %v1658_v13 = vpop.eup %1657 }
 0x40b   : > { %1169 = vst [vmem:[%s2414_s25 + $0xe0] sm:$0xff] %v1137_v54  ;;  %v1138_v12 = vmul.f32 %v1658_v13, %v2395_v61 }
 0x40d   : > { %1170 = vst [vmem:[%s2414_s25 + $0xe8] sm:$0xff] %v1138_v12 }
 0x410   : > { %v1660_v37 = vpop.eup %1659 }
 0x411   : > { %v1139_v18 = vmul.f32 %v1660_v37, %v2402_v62 }
 0x412   : > { %v1662_v34 = vpop.eup %1661 }
 0x413   : > { %1171 = vst [vmem:[%s2414_s25 + $0xf0] sm:$0xff] %v1139_v18  ;;  %v1140_v30 = vmul.f32 %v1662_v34, %v2405_v63 }
 0x415   : > { %1172 = vst [vmem:[%s2414_s25 + $0xf8] sm:$0xff] %v1140_v30 }
 0x416   : > { %1764 = shalt.err (!%p1761_p5)
}
 0x417   : > { %s1765_s20 = scalar_lea.hbm %s2481_s7, 4096  ;;  %s1769_s4 = scalar_lea.hbm %s2533_s3, 8192 }
 0x418   : > { %p1766_p6 = scmp.ne.s32.totalorder %s2481_s7, %s1765_s20  ;;  %p1770_p12 = scmp.lt.u32.totalorder %s2481_s7, %s2533_s3 }
 0x419   : > { %p1771_p10 = scmp.lt.u32.totalorder %s1769_s4, %s1765_s20  ;;  %p1773_p2 = scmp.lt.u32.totalorder %s1765_s20, %s2481_s7 }
 0x41a   : > { %p1767_p9 = pnand %p1766_p6, %p2554_p4 }
 0x41b   : > { %p1772_p1 = por %p1771_p10, %p1770_p12 }
 0x41c   : > { %p1768_p7 = pneg %p1767_p9 }
 0x41d   : > { %p1774_p0 = por %p1773_p2, %p1772_p1 }
 0x41f   : > { %p1775_p11 = pnand %p1774_p0, %p1768_p7 }
 0x421   : > { %1778 = shalt.err (!%p1775_p11)
}
 0x422   : > { %s1837_s30 = smov 128   ;;  %s1838_s25 = smov 8  }
 0x423   : > { %1529 = dma.vmem_to_hbm [thread:$0]  (%p2554_p4), %s2483_s5, 4096, %s2481_s7, %s1174_s27, %s1837_s30, %s1837_s30, %s1838_s25  }
 0x424 PF: > { %s1202_s26 = sand.u32 1, %s1813_s12   ;;  %p2555_p13 = scmp.ne.s32.totalorder %s2544_s28, 0 }
 0x425   : > { %p2556_p8 = scmp.ge.s32.totalorder %s1825_s15, 2  ;;  %s1203_s17 = scalar_lea.sflag [#allocation4], %s1202_s26 }
 0x427   : > { %p1543_p3 = pnand %p2556_p8, %p2555_p13 }
 0x429   : > { %1808 = dma.done.wait (!%p1543_p3), %s1203_s17, 4096  }
 0x42a   : > { %1810 = vsyncadd (!%p1543_p3), %s1203_s17, 4294963200  ;;  %p17_p5 = scmp.ge.s32.totalorder %s1880_s16, 4   ;;  %s2557_s12 = smov %s1817_s13 }
 0x42b   : > { %s2558_s13 = smov %s1821_s14  ;;  %s2559_s14 = smov %s1891_s19 }
 0x42c   : > { %s2560_s15 = smov %s1880_s16  ;;  %19 = sbr.rel (!%p17_p5) target bundleno = 6 (0x6), region = 92 }
 0x433   :  { %1208 = vsyncpa [#allocation3], 1 }
 0x434   :  { %1210 = vsyncpa [#allocation3 + $0x1], 1 }
 0x435   :  { %1211 = vsyncpa [#allocation6], 1 }
 0x436   :  { %1212 = vsyncpa [#allocation4], 1 }
 0x437   :  { %1214 = vsyncpa [#allocation4 + $0x1], 1 }

</bundles_post_ra>
